<compile_context>
chip_gen: v7x
topology: tpu7x:2x2x1
jax: 0.10.0
libtpu: 0.0.40
codegen_flags: <defaults>
</compile_context>

<pallas_src>
import functools

import jax
import jax.numpy as jnp
from jax.experimental import pallas as pl
from jax.experimental.pallas import tpu as pltpu


def cromac_kernel(n_agents, bs, H, Z, n_actions,
                  inp_ref, h0_ref,
                  fc1_w_ref, fc1_b_ref,
                  wih_ref, bih_ref, whh_ref, bhh_ref,
                  ew1_ref, eb1_ref, enc_w_ref, enc_b_ref,
                  q1_wz_ref, q1_wh_ref, q1_wa_ref,
                  q2_w_ref, q2_b_ref,
                  out_ref,
                  h_scr):
    f32 = jnp.float32
    eps = 1e-7
    B = bs * n_agents
    t = pl.program_id(0)

    # carry h in VMEM scratch across the (sequential, "arbitrary") time grid
    @pl.when(t == 0)
    def _():
        h_scr[...] = h0_ref[...]

    x = inp_ref[...]          # (B, D_in)  current timestep block
    h_in = h_scr[...]         # (B, H)

    # --- fc1 + relu (MXU #1) ---
    x1 = jnp.maximum(
        jnp.dot(x, fc1_w_ref[...], preferred_element_type=f32) + fc1_b_ref[...], 0.0)

    # --- GRUCell as two accumulating dots (no lane concat, no zero-padded weight blocks) ---
    gi = jnp.dot(x1, wih_ref[...], preferred_element_type=f32) + bih_ref[...]     # (B, 3H)
    gh = jnp.dot(h_in, whh_ref[...], preferred_element_type=f32) + bhh_ref[...]   # (B, 3H)
    rz = jax.nn.sigmoid(gi[:, :2 * H] + gh[:, :2 * H])   # one fused 2H-lane sigmoid
    r = rz[:, :H]
    zg = rz[:, H:]
    n = jnp.tanh(gi[:, 2 * H:] + r * gh[:, 2 * H:])
    h = (1.0 - zg) * n + zg * h_in
    h_scr[...] = h

    # --- VAE message encoder with fused mu/logvar heads ---
    he = jnp.maximum(
        jnp.dot(h, ew1_ref[...], preferred_element_type=f32) + eb1_ref[...], 0.0)
    ml = jnp.dot(he, enc_w_ref[...], preferred_element_type=f32) + enc_b_ref[...]  # (B, 2Z)
    mus = ml[:, :Z]
    logvars = jnp.clip(ml[:, Z:], -20.0, 20.0)

    # --- Product-of-Experts over each batch's n_agents contiguous rows + unit-Gaussian prior.
    #     Segmented per-batch sums via XLU roll-doubling on the lane-fused [T | mus*T] slab.
    var = jnp.exp(logvars) + eps
    T_ = pl.reciprocal(var + eps, approx=True)            # EUP, off the VALU slot
    TmuT = jnp.concatenate([T_, mus * T_], axis=1)        # (B, 2Z): one roll chain does both sums
    acc = TmuT
    pow2 = (n_agents & (n_agents - 1)) == 0
    if pow2:
        s = 1
        while s < n_agents:                               # log2 doubling (n_agents power of two)
            acc = acc + pltpu.roll(acc, shift=B - s, axis=0)
            s *= 2
    else:
        for a in range(1, n_agents):                      # fallback linear chain
            acc = acc + pltpu.roll(TmuT, shift=B - a, axis=0)
    # rows r = b*n_agents now hold that batch's sums (other rows hold cross-group junk, ignored)
    T_prior = 1.0 / (1.0 + 2.0 * eps)                     # prior expert: mu=0, logvar=0
    T_sum = acc[:, :Z] + T_prior
    muT_sum = acc[:, Z:]                                  # prior contributes 0 to the numerator
    poe = muT_sum / T_sum                                 # exact final divide (tight numerics)

    # repeat_interleave(poe_mu, n_agents): spread group-start rows down the group (roll doubling)
    ridx = jax.lax.broadcasted_iota(jnp.int32, (B, Z), 0)
    poe0 = jnp.where(ridx % n_agents == 0, poe, 0.0)
    z_rep = poe0
    if pow2:
        s = 1
        while s < n_agents:
            z_rep = z_rep + pltpu.roll(z_rep, shift=s, axis=0)
            s *= 2
    else:
        for a in range(1, n_agents):
            z_rep = z_rep + pltpu.roll(poe0, shift=a, axis=0)

    # --- Compute_Q: split dots for z/h + tiny agent-one-hot dot (one-hot generated from iota,
    #     (n_agents,16) table already has q1_b folded in -> no O(B) bias stream from HBM).
    rr = jax.lax.broadcasted_iota(jnp.int32, (B, n_agents), 0)
    cc = jax.lax.broadcasted_iota(jnp.int32, (B, n_agents), 1)
    agent_oh = (cc == rr % n_agents).astype(f32)
    q1 = (jnp.dot(z_rep, q1_wz_ref[...], preferred_element_type=f32)
          + jnp.dot(h, q1_wh_ref[...], preferred_element_type=f32)
          + jnp.dot(agent_oh, q1_wa_ref[...], preferred_element_type=f32))
    q = jnp.dot(jnp.maximum(q1, 0.0), q2_w_ref[...],
                preferred_element_type=f32) + q2_b_ref[...]

    # packed output slab: one lane-contiguous store per step, split in the wrapper
    out_ref[...] = jnp.concatenate([q, h], axis=1)


def init_params(key, d_in, H, Vh, Z, n_agents, n_actions):
    """Deterministic synthetic parameters. Linear weights stored as [in, out]."""
    ks = jax.random.split(key, 16)
    def w(k, i, o, fan):
        s = 1.0 / jnp.sqrt(fan)
        return jax.random.uniform(k, (i, o), jnp.float32, -s, s)
    def b(k, o, fan):
        s = 1.0 / jnp.sqrt(fan)
        return jax.random.uniform(k, (1, o), jnp.float32, -s, s)
    p = {}
    p["fc1_w"] = w(ks[0], d_in, H, d_in);       p["fc1_b"] = b(ks[1], H, d_in)
    p["w_ih"] = w(ks[2], H, 3 * H, H);          p["b_ih"] = b(ks[3], 3 * H, H)
    p["w_hh"] = w(ks[4], H, 3 * H, H);          p["b_hh"] = b(ks[5], 3 * H, H)
    p["ew1"] = w(ks[6], H, Vh, H);              p["eb1"] = b(ks[7], Vh, H)
    p["ew2"] = w(ks[8], Vh, Z, Vh);             p["eb2"] = b(ks[9], Z, Vh)
    p["ew3"] = w(ks[10], Vh, Z, Vh);            p["eb3"] = b(ks[11], Z, Vh)
    fan_q1 = Z + H + n_agents
    p["q1_w"] = w(ks[12], fan_q1, 16, fan_q1);  p["q1_b"] = b(ks[13], 16, fan_q1)
    p["q2_w"] = w(ks[14], 16, n_actions, 16);   p["q2_b"] = b(ks[15], n_actions, 16)
    return p


def cromac_forward(params, inputs_seq, hidden_state, *, n_agents, bs, H, Z, n_actions):
    """inputs_seq: (T, B, d_in) rollout; hidden_state: (B, H) initial GRU state.
    Returns (q_seq (T,B,n_actions), h_seq (T,B,H)). Single pallas_call over the whole rollout."""
    T_steps, B, d_in = inputs_seq.shape
    assert B == bs * n_agents
    f32 = jnp.float32

    # --- wrapper-side weight prep (pure glue, done once per rollout) ---
    q1_wz = params["q1_w"][:Z]                                    # (Z, 16)
    q1_wh = params["q1_w"][Z:Z + H]                               # (H, 16)
    q1_wa = params["q1_w"][Z + H:] + params["q1_b"]               # (n_agents, 16), q1_b folded in
    enc_w = jnp.concatenate([params["ew2"], params["ew3"]], axis=1)   # (Vh, 2Z) fused mu|logvar
    enc_b = jnp.concatenate([params["eb2"], params["eb3"]], axis=1)   # (1, 2Z)

    weights = (params["fc1_w"], params["fc1_b"],
               params["w_ih"], params["b_ih"], params["w_hh"], params["b_hh"],
               params["ew1"], params["eb1"], enc_w, enc_b,
               q1_wz, q1_wh, q1_wa,
               params["q2_w"], params["q2_b"])

    def pinned(a):                    # whole-array block, constant index -> fetched once
        nd = a.ndim
        return pl.BlockSpec(a.shape, lambda t, _nd=nd: (0,) * _nd)

    in_specs = ([pl.BlockSpec((None, B, d_in), lambda t: (t, 0, 0)),   # time-blocked inputs
                 pinned(hidden_state)]
                + [pinned(w) for w in weights])
    out_spec = pl.BlockSpec((None, B, n_actions + H), lambda t: (t, 0, 0))

    kernel = functools.partial(cromac_kernel, n_agents, bs, H, Z, n_actions)
    slab = pl.pallas_call(
        kernel,
        out_shape=jax.ShapeDtypeStruct((T_steps, B, n_actions + H), f32),
        grid_spec=pltpu.PrefetchScalarGridSpec(
            num_scalar_prefetch=0,
            grid=(T_steps,),
            in_specs=in_specs,
            out_specs=out_spec,
            scratch_shapes=[pltpu.VMEM((B, H), f32)]),      # recurrent h carried in VMEM
        compiler_params=pltpu.CompilerParams(
            dimension_semantics=("arbitrary",)),            # time axis is a recurrence
    )(inputs_seq, hidden_state, *weights)

    q_seq = slab[:, :, :n_actions]
    h_seq = slab[:, :, n_actions:]
    return q_seq, h_seq


def cromac_reference_step(params, x_t, h_in, *, n_agents, bs, H, Z):
    """Pure-JAX mirror of one PyTorch forward step (test_mode, no noise) for validation."""
    eps = 1e-7
    relu = lambda v: jnp.maximum(v, 0.0)
    x1 = relu(x_t @ params["fc1_w"] + params["fc1_b"])
    gi = x1 @ params["w_ih"] + params["b_ih"]
    gh = h_in @ params["w_hh"] + params["b_hh"]
    r = jax.nn.sigmoid(gi[:, :H] + gh[:, :H])
    zg = jax.nn.sigmoid(gi[:, H:2 * H] + gh[:, H:2 * H])
    n = jnp.tanh(gi[:, 2 * H:] + r * gh[:, 2 * H:])
    h = (1.0 - zg) * n + zg * h_in
    he = relu(h @ params["ew1"] + params["eb1"])
    mus = he @ params["ew2"] + params["eb2"]
    logvars = jnp.clip(he @ params["ew3"] + params["eb3"], -20.0, 20.0)  # VAE_Encoder clamp
    mus3 = mus.reshape(bs, n_agents, Z)
    lv3 = logvars.reshape(bs, n_agents, Z)
    mu_cat = jnp.concatenate([jnp.zeros((bs, 1, Z)), mus3], axis=1)
    lv_cat = jnp.concatenate([jnp.zeros((bs, 1, Z)), lv3], axis=1)
    var = jnp.exp(lv_cat) + eps
    T = 1.0 / (var + eps)
    poe_mu = (mu_cat * T).sum(1) / T.sum(1)
    z_rep = jnp.repeat(poe_mu, n_agents, axis=0)
    agent_id = jnp.tile(jnp.eye(n_agents, dtype=jnp.float32), (bs, 1))
    q1 = jnp.concatenate([z_rep, h, agent_id], axis=1) @ params["q1_w"] + params["q1_b"]
    q = relu(q1) @ params["q2_w"] + params["q2_b"]
    return q, h


if __name__ == "__main__":
    # small shapes consistent with the module
    T_steps = 8          # rollout length folded into the kernel grid
    bs, n_agents = 2, 4
    B = bs * n_agents
    d_in = 24            # input_shape (obs features)
    H = 32               # rnn_hidden_dim
    Vh = 32              # vae_hidden_dim
    Z = 16               # z_dim
    n_actions = 8

    key = jax.random.PRNGKey(0)
    kp, ki, kh = jax.random.split(key, 3)
    params = init_params(kp, d_in, H, Vh, Z, n_agents, n_actions)
    inputs_seq = jax.random.normal(ki, (T_steps, B, d_in), jnp.float32)
    h0 = jax.random.normal(kh, (B, H), jnp.float32) * 0.1

    # pure-JAX reference rollout
    h = h0
    q_ref_l, h_ref_l = [], []
    for t in range(T_steps):
        q_t, h = cromac_reference_step(params, inputs_seq[t], h,
                                       n_agents=n_agents, bs=bs, H=H, Z=Z)
        q_ref_l.append(q_t)
        h_ref_l.append(h)
    q_ref = jnp.stack(q_ref_l)
    h_ref = jnp.stack(h_ref_l)

    q_seq, h_seq = cromac_forward(params, inputs_seq, h0,
                                  n_agents=n_agents, bs=bs, H=H, Z=Z, n_actions=n_actions)
    q_seq = jax.block_until_ready(q_seq)
    h_seq = jax.block_until_ready(h_seq)

    assert q_seq.shape == (T_steps, B, n_actions) and h_seq.shape == (T_steps, B, H)
    # h is exact f32 math (same op structure as the reference)
    assert jnp.allclose(h_seq, h_ref, rtol=1e-3, atol=1e-3)
    # q uses one EUP approx reciprocal in the PoE; final divide is exact
    assert jnp.allclose(q_seq, q_ref, rtol=5e-3, atol=5e-3)
    print("KERNEL_OK")
</pallas_src>

<mosaic_0001>
module attributes {stable_mosaic.version = 11 : i64} {
  func.func @cromac_kernel(%arg0: i32, %arg1: memref<1x8x24xf32, #tpu.memory_space<vmem>>, %arg2: memref<8x32xf32, #tpu.memory_space<vmem>>, %arg3: memref<24x32xf32, #tpu.memory_space<vmem>>, %arg4: memref<1x32xf32, #tpu.memory_space<vmem>>, %arg5: memref<32x96xf32, #tpu.memory_space<vmem>>, %arg6: memref<1x96xf32, #tpu.memory_space<vmem>>, %arg7: memref<32x96xf32, #tpu.memory_space<vmem>>, %arg8: memref<1x96xf32, #tpu.memory_space<vmem>>, %arg9: memref<32x32xf32, #tpu.memory_space<vmem>>, %arg10: memref<1x32xf32, #tpu.memory_space<vmem>>, %arg11: memref<32x32xf32, #tpu.memory_space<vmem>>, %arg12: memref<1x32xf32, #tpu.memory_space<vmem>>, %arg13: memref<16x16xf32, #tpu.memory_space<vmem>>, %arg14: memref<32x16xf32, #tpu.memory_space<vmem>>, %arg15: memref<4x16xf32, #tpu.memory_space<vmem>>, %arg16: memref<16x8xf32, #tpu.memory_space<vmem>>, %arg17: memref<1x8xf32, #tpu.memory_space<vmem>>, %arg18: memref<1x8x40xf32, #tpu.memory_space<vmem>>, %arg19: memref<8x32xf32, #tpu.memory_space<vmem>>) attributes {dimension_semantics = [#tpu.dimension_semantics<arbitrary>], iteration_bounds = array<i64: 8>, scalar_prefetch = 0 : i64, scratch_operands = 1 : i64, tpu.core_type = #tpu.core_type<tc>, window_params = [{transform_indices = @transform_0, window_bounds = array<i64: 1, 8, 24>}, {pipeline_mode = #tpu.pipeline_mode<synchronous>, transform_indices = @transform_1, window_bounds = array<i64: 8, 32>}, {pipeline_mode = #tpu.pipeline_mode<synchronous>, transform_indices = @transform_2, window_bounds = array<i64: 24, 32>}, {pipeline_mode = #tpu.pipeline_mode<synchronous>, transform_indices = @transform_3, window_bounds = array<i64: 1, 32>}, {pipeline_mode = #tpu.pipeline_mode<synchronous>, transform_indices = @transform_4, window_bounds = array<i64: 32, 96>}, {pipeline_mode = #tpu.pipeline_mode<synchronous>, transform_indices = @transform_5, window_bounds = array<i64: 1, 96>}, {pipeline_mode = #tpu.pipeline_mode<synchronous>, transform_indices = @transform_6, window_bounds = array<i64: 32, 96>}, {pipeline_mode = #tpu.pipeline_mode<synchronous>, transform_indices = @transform_7, window_bounds = array<i64: 1, 96>}, {pipeline_mode = #tpu.pipeline_mode<synchronous>, transform_indices = @transform_8, window_bounds = array<i64: 32, 32>}, {pipeline_mode = #tpu.pipeline_mode<synchronous>, transform_indices = @transform_9, window_bounds = array<i64: 1, 32>}, {pipeline_mode = #tpu.pipeline_mode<synchronous>, transform_indices = @transform_10, window_bounds = array<i64: 32, 32>}, {pipeline_mode = #tpu.pipeline_mode<synchronous>, transform_indices = @transform_11, window_bounds = array<i64: 1, 32>}, {pipeline_mode = #tpu.pipeline_mode<synchronous>, transform_indices = @transform_12, window_bounds = array<i64: 16, 16>}, {pipeline_mode = #tpu.pipeline_mode<synchronous>, transform_indices = @transform_13, window_bounds = array<i64: 32, 16>}, {pipeline_mode = #tpu.pipeline_mode<synchronous>, transform_indices = @transform_14, window_bounds = array<i64: 4, 16>}, {pipeline_mode = #tpu.pipeline_mode<synchronous>, transform_indices = @transform_15, window_bounds = array<i64: 16, 8>}, {pipeline_mode = #tpu.pipeline_mode<synchronous>, transform_indices = @transform_16, window_bounds = array<i64: 1, 8>}, {transform_indices = @transform_17, window_bounds = array<i64: 1, 8, 40>}]} {
    %c0_i32 = arith.constant 0 : i32
    %0 = arith.cmpi eq, %arg0, %c0_i32 : i32
    %1 = arith.extui %0 : i1 to i32
    %c0_i32_0 = arith.constant 0 : i32
    %2 = arith.cmpi ne, %1, %c0_i32_0 : i32
    scf.if %2 {
      %c0_71 = arith.constant 0 : index
      %c0_72 = arith.constant 0 : index
      %144 = vector.load %arg2[%c0_71, %c0_72] : memref<8x32xf32, #tpu.memory_space<vmem>>, vector<8x32xf32>
      %c0_73 = arith.constant 0 : index
      %c0_74 = arith.constant 0 : index
      %145 = vector.load %arg19[%c0_73, %c0_74] : memref<8x32xf32, #tpu.memory_space<vmem>>, vector<8x32xf32>
      tpu.vector_store %arg19[%c0_73, %c0_74], %144 {strides = array<i32>} : memref<8x32xf32, #tpu.memory_space<vmem>>, vector<8x32xf32>,
    } else {
    }
    %c0 = arith.constant 0 : index
    %c0_1 = arith.constant 0 : index
    %c0_2 = arith.constant 0 : index
    %3 = vector.load %arg1[%c0, %c0_1, %c0_2] : memref<1x8x24xf32, #tpu.memory_space<vmem>>, vector<1x8x24xf32>
    %4 = vector.shape_cast %3 : vector<1x8x24xf32> to vector<8x24xf32>
    %c0_3 = arith.constant 0 : index
    %c0_4 = arith.constant 0 : index
    %5 = vector.load %arg19[%c0_3, %c0_4] : memref<8x32xf32, #tpu.memory_space<vmem>>, vector<8x32xf32>
    %c0_5 = arith.constant 0 : index
    %c0_6 = arith.constant 0 : index
    %6 = vector.load %arg3[%c0_5, %c0_6] : memref<24x32xf32, #tpu.memory_space<vmem>>, vector<24x32xf32>
    %cst = arith.constant dense<0.000000e+00> : vector<8x32xf32>
    %7 = tpu.matmul %4, %6, %cst {dimension_numbers = #tpu.dot_dimension_numbers<[1], [0], [0], [1], [0, 0, 1, 1], [], []>} : vector<8x24xf32>, vector<24x32xf32>, vector<8x32xf32> -> vector<8x32xf32>
    %c0_7 = arith.constant 0 : index
    %c0_8 = arith.constant 0 : index
    %8 = vector.load %arg4[%c0_7, %c0_8] : memref<1x32xf32, #tpu.memory_space<vmem>>, vector<1x32xf32>
    %9 = vector.broadcast %8 : vector<1x32xf32> to vector<8x32xf32>
    %10 = arith.addf %7, %9 : vector<8x32xf32>
    %cst_9 = arith.constant 0.000000e+00 : f32
    %11 = vector.broadcast %cst_9 : f32 to vector<8x32xf32>
    %12 = arith.maximumf %10, %11 : vector<8x32xf32>
    %c0_10 = arith.constant 0 : index
    %c0_11 = arith.constant 0 : index
    %13 = vector.load %arg5[%c0_10, %c0_11] : memref<32x96xf32, #tpu.memory_space<vmem>>, vector<32x96xf32>
    %cst_12 = arith.constant dense<0.000000e+00> : vector<8x96xf32>
    %14 = tpu.matmul %12, %13, %cst_12 {dimension_numbers = #tpu.dot_dimension_numbers<[1], [0], [0], [1], [0, 0, 1, 1], [], []>} : vector<8x32xf32>, vector<32x96xf32>, vector<8x96xf32> -> vector<8x96xf32>
    %c0_13 = arith.constant 0 : index
    %c0_14 = arith.constant 0 : index
    %15 = vector.load %arg6[%c0_13, %c0_14] : memref<1x96xf32, #tpu.memory_space<vmem>>, vector<1x96xf32>
    %16 = vector.broadcast %15 : vector<1x96xf32> to vector<8x96xf32>
    %17 = arith.addf %14, %16 : vector<8x96xf32>
    %c0_15 = arith.constant 0 : index
    %c0_16 = arith.constant 0 : index
    %18 = vector.load %arg7[%c0_15, %c0_16] : memref<32x96xf32, #tpu.memory_space<vmem>>, vector<32x96xf32>
    %cst_17 = arith.constant dense<0.000000e+00> : vector<8x96xf32>
    %19 = tpu.matmul %5, %18, %cst_17 {dimension_numbers = #tpu.dot_dimension_numbers<[1], [0], [0], [1], [0, 0, 1, 1], [], []>} : vector<8x32xf32>, vector<32x96xf32>, vector<8x96xf32> -> vector<8x96xf32>
    %c0_18 = arith.constant 0 : index
    %c0_19 = arith.constant 0 : index
    %20 = vector.load %arg8[%c0_18, %c0_19] : memref<1x96xf32, #tpu.memory_space<vmem>>, vector<1x96xf32>
    %21 = vector.broadcast %20 : vector<1x96xf32> to vector<8x96xf32>
    %22 = arith.addf %19, %21 : vector<8x96xf32>
    %23 = vector.extract_strided_slice %17 {offsets = [0, 0], sizes = [8, 64], strides = [1, 1]} : vector<8x96xf32> to vector<8x64xf32>
    %24 = vector.extract_strided_slice %22 {offsets = [0, 0], sizes = [8, 64], strides = [1, 1]} : vector<8x96xf32> to vector<8x64xf32>
    %25 = arith.addf %23, %24 : vector<8x64xf32>
    %26 = arith.negf %25 : vector<8x64xf32>
    %27 = math.exp %26 : vector<8x64xf32>
    %cst_20 = arith.constant 1.000000e+00 : f32
    %28 = vector.broadcast %cst_20 : f32 to vector<8x64xf32>
    %29 = arith.addf %28, %27 : vector<8x64xf32>
    %30 = arith.divf %28, %29 : vector<8x64xf32>
    %31 = vector.extract_strided_slice %30 {offsets = [0, 0], sizes = [8, 32], strides = [1, 1]} : vector<8x64xf32> to vector<8x32xf32>
    %32 = vector.extract_strided_slice %30 {offsets = [0, 32], sizes = [8, 32], strides = [1, 1]} : vector<8x64xf32> to vector<8x32xf32>
    %33 = vector.extract_strided_slice %17 {offsets = [0, 64], sizes = [8, 32], strides = [1, 1]} : vector<8x96xf32> to vector<8x32xf32>
    %34 = vector.extract_strided_slice %22 {offsets = [0, 64], sizes = [8, 32], strides = [1, 1]} : vector<8x96xf32> to vector<8x32xf32>
    %35 = arith.mulf %31, %34 : vector<8x32xf32>
    %36 = arith.addf %33, %35 : vector<8x32xf32>
    %37 = math.tanh %36 : vector<8x32xf32>
    %cst_21 = arith.constant 1.000000e+00 : f32
    %38 = vector.broadcast %cst_21 : f32 to vector<8x32xf32>
    %39 = arith.subf %38, %32 : vector<8x32xf32>
    %40 = arith.mulf %39, %37 : vector<8x32xf32>
    %41 = arith.mulf %32, %5 : vector<8x32xf32>
    %42 = arith.addf %40, %41 : vector<8x32xf32>
    %c0_22 = arith.constant 0 : index
    %c0_23 = arith.constant 0 : index
    %43 = vector.load %arg19[%c0_22, %c0_23] : memref<8x32xf32, #tpu.memory_space<vmem>>, vector<8x32xf32>
    tpu.vector_store %arg19[%c0_22, %c0_23], %42 {strides = array<i32>} : memref<8x32xf32, #tpu.memory_space<vmem>>, vector<8x32xf32>,
    %c0_24 = arith.constant 0 : index
    %c0_25 = arith.constant 0 : index
    %44 = vector.load %arg9[%c0_24, %c0_25] : memref<32x32xf32, #tpu.memory_space<vmem>>, vector<32x32xf32>
    %cst_26 = arith.constant dense<0.000000e+00> : vector<8x32xf32>
    %45 = tpu.matmul %42, %44, %cst_26 {dimension_numbers = #tpu.dot_dimension_numbers<[1], [0], [0], [1], [0, 0, 1, 1], [], []>} : vector<8x32xf32>, vector<32x32xf32>, vector<8x32xf32> -> vector<8x32xf32>
    %c0_27 = arith.constant 0 : index
    %c0_28 = arith.constant 0 : index
    %46 = vector.load %arg10[%c0_27, %c0_28] : memref<1x32xf32, #tpu.memory_space<vmem>>, vector<1x32xf32>
    %47 = vector.broadcast %46 : vector<1x32xf32> to vector<8x32xf32>
    %48 = arith.addf %45, %47 : vector<8x32xf32>
    %cst_29 = arith.constant 0.000000e+00 : f32
    %49 = vector.broadcast %cst_29 : f32 to vector<8x32xf32>
    %50 = arith.maximumf %48, %49 : vector<8x32xf32>
    %c0_30 = arith.constant 0 : index
    %c0_31 = arith.constant 0 : index
    %51 = vector.load %arg11[%c0_30, %c0_31] : memref<32x32xf32, #tpu.memory_space<vmem>>, vector<32x32xf32>
    %cst_32 = arith.constant dense<0.000000e+00> : vector<8x32xf32>
    %52 = tpu.matmul %50, %51, %cst_32 {dimension_numbers = #tpu.dot_dimension_numbers<[1], [0], [0], [1], [0, 0, 1, 1], [], []>} : vector<8x32xf32>, vector<32x32xf32>, vector<8x32xf32> -> vector<8x32xf32>
    %c0_33 = arith.constant 0 : index
    %c0_34 = arith.constant 0 : index
    %53 = vector.load %arg12[%c0_33, %c0_34] : memref<1x32xf32, #tpu.memory_space<vmem>>, vector<1x32xf32>
    %54 = vector.broadcast %53 : vector<1x32xf32> to vector<8x32xf32>
    %55 = arith.addf %52, %54 : vector<8x32xf32>
    %56 = vector.extract_strided_slice %55 {offsets = [0, 0], sizes = [8, 16], strides = [1, 1]} : vector<8x32xf32> to vector<8x16xf32>
    %57 = vector.extract_strided_slice %55 {offsets = [0, 16], sizes = [8, 16], strides = [1, 1]} : vector<8x32xf32> to vector<8x16xf32>
    %cst_35 = arith.constant -2.000000e+01 : f32
    %cst_36 = arith.constant 2.000000e+01 : f32
    %58 = vector.broadcast %cst_35 : f32 to vector<8x16xf32>
    %59 = arith.maximumf %58, %57 : vector<8x16xf32>
    %60 = vector.broadcast %cst_36 : f32 to vector<8x16xf32>
    %61 = arith.minimumf %60, %59 : vector<8x16xf32>
    %62 = math.exp %61 : vector<8x16xf32>
    %cst_37 = arith.constant 1.000000e-07 : f32
    %63 = vector.broadcast %cst_37 : f32 to vector<8x16xf32>
    %64 = arith.addf %62, %63 : vector<8x16xf32>
    %cst_38 = arith.constant 1.000000e-07 : f32
    %65 = vector.broadcast %cst_38 : f32 to vector<8x16xf32>
    %66 = arith.addf %64, %65 : vector<8x16xf32>
    %67 = tpu.reciprocal %66 {approx = true} : vector<8x16xf32> -> vector<8x16xf32>
    %68 = arith.mulf %56, %67 : vector<8x16xf32>
    %69 = tpu.concatenate %67, %68 in 1 : vector<8x16xf32>, vector<8x16xf32> -> vector<8x32xf32>
    %c7_i32 = arith.constant 7 : i32
    %70 = tpu.dynamic_rotate %69 by %c7_i32 dim 0 : vector<8x32xf32>, i32 -> vector<8x32xf32>
    %71 = arith.addf %69, %70 : vector<8x32xf32>
    %c6_i32 = arith.constant 6 : i32
    %72 = tpu.dynamic_rotate %71 by %c6_i32 dim 0 : vector<8x32xf32>, i32 -> vector<8x32xf32>
    %73 = arith.addf %71, %72 : vector<8x32xf32>
    %74 = vector.extract_strided_slice %73 {offsets = [0, 0], sizes = [8, 16], strides = [1, 1]} : vector<8x32xf32> to vector<8x16xf32>
    %cst_39 = arith.constant 0.999999821 : f32
    %75 = vector.broadcast %cst_39 : f32 to vector<8x16xf32>
    %76 = arith.addf %74, %75 : vector<8x16xf32>
    %77 = vector.extract_strided_slice %73 {offsets = [0, 16], sizes = [8, 16], strides = [1, 1]} : vector<8x32xf32> to vector<8x16xf32>
    %78 = arith.divf %77, %76 : vector<8x16xf32>
    %79 = tpu.iota {dimensions = array<i32: 0>} : vector<8x16xi32>
    %c4_i32 = arith.constant 4 : i32
    %c0_i32_40 = arith.constant 0 : i32
    %80 = arith.cmpi eq, %c4_i32, %c0_i32_40 : i32
    %c1_i32 = arith.constant 1 : i32
    %81 = arith.select %80, %c1_i32, %c4_i32 : i32
    %82 = vector.broadcast %81 : i32 to vector<8x16xi32>
    %83 = arith.remsi %79, %82 : vector<8x16xi32>
    %c0_i32_41 = arith.constant 0 : i32
    %84 = vector.broadcast %c0_i32_41 : i32 to vector<8x16xi32>
    %85 = arith.cmpi ne, %83, %84 : vector<8x16xi32>
    %c0_i32_42 = arith.constant 0 : i32
    %86 = vector.broadcast %c0_i32_42 : i32 to vector<8x16xi32>
    %87 = arith.cmpi slt, %83, %86 : vector<8x16xi32>
    %c0_i32_43 = arith.constant 0 : i32
    %88 = arith.cmpi slt, %81, %c0_i32_43 : i32
    %89 = vector.broadcast %88 : i1 to vector<8x16xi1>
    %90 = vector.broadcast %89 : vector<8x16xi1> to vector<8x16xi1>
    %91 = arith.xori %87, %90 : vector<8x16xi1>
    %92 = arith.andi %91, %85 : vector<8x16xi1>
    %93 = vector.broadcast %81 : i32 to vector<8x16xi32>
    %94 = arith.addi %83, %93 : vector<8x16xi32>
    %95 = arith.select %92, %94, %83 : vector<8x16xi1>, vector<8x16xi32>
    %c0_i32_44 = arith.constant 0 : i32
    %96 = vector.broadcast %c0_i32_44 : i32 to vector<8x16xi32>
    %97 = arith.cmpi eq, %95, %96 : vector<8x16xi32>
    %cst_45 = arith.constant 0.000000e+00 : f32
    %98 = vector.broadcast %cst_45 : f32 to vector<8x16xf32>
    %99 = arith.select %97, %78, %98 : vector<8x16xi1>, vector<8x16xf32>
    %c1_i32_46 = arith.constant 1 : i32
    %100 = tpu.dynamic_rotate %99 by %c1_i32_46 dim 0 : vector<8x16xf32>, i32 -> vector<8x16xf32>
    %101 = arith.addf %99, %100 : vector<8x16xf32>
    %c2_i32 = arith.constant 2 : i32
    %102 = tpu.dynamic_rotate %101 by %c2_i32 dim 0 : vector<8x16xf32>, i32 -> vector<8x16xf32>
    %103 = arith.addf %101, %102 : vector<8x16xf32>
    %104 = tpu.iota {dimensions = array<i32: 0>} : vector<8x4xi32>
    %105 = tpu.iota {dimensions = array<i32: 1>} : vector<8x4xi32>
    %c4_i32_47 = arith.constant 4 : i32
    %c0_i32_48 = arith.constant 0 : i32
    %106 = arith.cmpi eq, %c4_i32_47, %c0_i32_48 : i32
    %c1_i32_49 = arith.constant 1 : i32
    %107 = arith.select %106, %c1_i32_49, %c4_i32_47 : i32
    %108 = vector.broadcast %107 : i32 to vector<8x4xi32>
    %109 = arith.remsi %104, %108 : vector<8x4xi32>
    %c0_i32_50 = arith.constant 0 : i32
    %110 = vector.broadcast %c0_i32_50 : i32 to vector<8x4xi32>
    %111 = arith.cmpi ne, %109, %110 : vector<8x4xi32>
    %c0_i32_51 = arith.constant 0 : i32
    %112 = vector.broadcast %c0_i32_51 : i32 to vector<8x4xi32>
    %113 = arith.cmpi slt, %109, %112 : vector<8x4xi32>
    %c0_i32_52 = arith.constant 0 : i32
    %114 = arith.cmpi slt, %107, %c0_i32_52 : i32
    %115 = vector.broadcast %114 : i1 to vector<8x4xi1>
    %116 = vector.broadcast %115 : vector<8x4xi1> to vector<8x4xi1>
    %117 = arith.xori %113, %116 : vector<8x4xi1>
    %118 = arith.andi %117, %111 : vector<8x4xi1>
    %119 = vector.broadcast %107 : i32 to vector<8x4xi32>
    %120 = arith.addi %109, %119 : vector<8x4xi32>
    %121 = arith.select %118, %120, %109 : vector<8x4xi1>, vector<8x4xi32>
    %122 = arith.cmpi eq, %105, %121 : vector<8x4xi32>
    %123 = arith.extui %122 : vector<8x4xi1> to vector<8x4xi32>
    %124 = arith.sitofp %123 : vector<8x4xi32> to vector<8x4xf32>
    %c0_53 = arith.constant 0 : index
    %c0_54 = arith.constant 0 : index
    %125 = vector.load %arg13[%c0_53, %c0_54] : memref<16x16xf32, #tpu.memory_space<vmem>>, vector<16x16xf32>
    %cst_55 = arith.constant dense<0.000000e+00> : vector<8x16xf32>
    %126 = tpu.matmul %103, %125, %cst_55 {dimension_numbers = #tpu.dot_dimension_numbers<[1], [0], [0], [1], [0, 0, 1, 1], [], []>} : vector<8x16xf32>, vector<16x16xf32>, vector<8x16xf32> -> vector<8x16xf32>
    %c0_56 = arith.constant 0 : index
    %c0_57 = arith.constant 0 : index
    %127 = vector.load %arg14[%c0_56, %c0_57] : memref<32x16xf32, #tpu.memory_space<vmem>>, vector<32x16xf32>
    %cst_58 = arith.constant dense<0.000000e+00> : vector<8x16xf32>
    %128 = tpu.matmul %42, %127, %cst_58 {dimension_numbers = #tpu.dot_dimension_numbers<[1], [0], [0], [1], [0, 0, 1, 1], [], []>} : vector<8x32xf32>, vector<32x16xf32>, vector<8x16xf32> -> vector<8x16xf32>
    %129 = arith.addf %126, %128 : vector<8x16xf32>
    %c0_59 = arith.constant 0 : index
    %c0_60 = arith.constant 0 : index
    %130 = vector.load %arg15[%c0_59, %c0_60] : memref<4x16xf32, #tpu.memory_space<vmem>>, vector<4x16xf32>
    %cst_61 = arith.constant dense<0.000000e+00> : vector<8x16xf32>
    %131 = tpu.matmul %124, %130, %cst_61 {dimension_numbers = #tpu.dot_dimension_numbers<[1], [0], [0], [1], [0, 0, 1, 1], [], []>} : vector<8x4xf32>, vector<4x16xf32>, vector<8x16xf32> -> vector<8x16xf32>
    %132 = arith.addf %129, %131 : vector<8x16xf32>
    %cst_62 = arith.constant 0.000000e+00 : f32
    %133 = vector.broadcast %cst_62 : f32 to vector<8x16xf32>
    %134 = arith.maximumf %132, %133 : vector<8x16xf32>
    %c0_63 = arith.constant 0 : index
    %c0_64 = arith.constant 0 : index
    %135 = vector.load %arg16[%c0_63, %c0_64] : memref<16x8xf32, #tpu.memory_space<vmem>>, vector<16x8xf32>
    %cst_65 = arith.constant dense<0.000000e+00> : vector<8x8xf32>
    %136 = tpu.matmul %134, %135, %cst_65 {dimension_numbers = #tpu.dot_dimension_numbers<[1], [0], [0], [1], [0, 0, 1, 1], [], []>} : vector<8x16xf32>, vector<16x8xf32>, vector<8x8xf32> -> vector<8x8xf32>
    %c0_66 = arith.constant 0 : index
    %c0_67 = arith.constant 0 : index
    %137 = vector.load %arg17[%c0_66, %c0_67] : memref<1x8xf32, #tpu.memory_space<vmem>>, vector<1x8xf32>
    %138 = vector.broadcast %137 : vector<1x8xf32> to vector<8x8xf32>
    %139 = arith.addf %136, %138 : vector<8x8xf32>
    %140 = tpu.concatenate %139, %42 in 1 : vector<8x8xf32>, vector<8x32xf32> -> vector<8x40xf32>
    %c0_68 = arith.constant 0 : index
    %c0_69 = arith.constant 0 : index
    %c0_70 = arith.constant 0 : index
    %141 = vector.load %arg18[%c0_68, %c0_69, %c0_70] : memref<1x8x40xf32, #tpu.memory_space<vmem>>, vector<1x8x40xf32>
    %142 = vector.shape_cast %141 : vector<1x8x40xf32> to vector<8x40xf32>
    %143 = vector.shape_cast %140 : vector<8x40xf32> to vector<1x8x40xf32>
    tpu.vector_store %arg18[%c0_68, %c0_69, %c0_70], %143 {strides = array<i32>} : memref<1x8x40xf32, #tpu.memory_space<vmem>>, vector<1x8x40xf32>,
    return
  }
  func.func @transform_0(%arg0: i32) -> (i32, i32, i32) {
    %c0_i32 = arith.constant 0 : i32
    %c0_i32_0 = arith.constant 0 : i32
    %c0_i32_1 = arith.constant 0 : i32
    return %arg0, %c0_i32, %c0_i32_0 : i32, i32, i32
  }
  func.func @transform_1(%arg0: i32) -> (i32, i32) {
    %c0_i32 = arith.constant 0 : i32
    %c0_i32_0 = arith.constant 0 : i32
    %c0_i32_1 = arith.constant 0 : i32
    return %c0_i32, %c0_i32_0 : i32, i32
  }
  func.func @transform_2(%arg0: i32) -> (i32, i32) {
    %c0_i32 = arith.constant 0 : i32
    %c0_i32_0 = arith.constant 0 : i32
    %c0_i32_1 = arith.constant 0 : i32
    return %c0_i32, %c0_i32_0 : i32, i32
  }
  func.func @transform_3(%arg0: i32) -> (i32, i32) {
    %c0_i32 = arith.constant 0 : i32
    %c0_i32_0 = arith.constant 0 : i32
    %c0_i32_1 = arith.constant 0 : i32
    return %c0_i32, %c0_i32_0 : i32, i32
  }
  func.func @transform_4(%arg0: i32) -> (i32, i32) {
    %c0_i32 = arith.constant 0 : i32
    %c0_i32_0 = arith.constant 0 : i32
    %c0_i32_1 = arith.constant 0 : i32
    return %c0_i32, %c0_i32_0 : i32, i32
  }
  func.func @transform_5(%arg0: i32) -> (i32, i32) {
    %c0_i32 = arith.constant 0 : i32
    %c0_i32_0 = arith.constant 0 : i32
    %c0_i32_1 = arith.constant 0 : i32
    return %c0_i32, %c0_i32_0 : i32, i32
  }
  func.func @transform_6(%arg0: i32) -> (i32, i32) {
    %c0_i32 = arith.constant 0 : i32
    %c0_i32_0 = arith.constant 0 : i32
    %c0_i32_1 = arith.constant 0 : i32
    return %c0_i32, %c0_i32_0 : i32, i32
  }
  func.func @transform_7(%arg0: i32) -> (i32, i32) {
    %c0_i32 = arith.constant 0 : i32
    %c0_i32_0 = arith.constant 0 : i32
    %c0_i32_1 = arith.constant 0 : i32
    return %c0_i32, %c0_i32_0 : i32, i32
  }
  func.func @transform_8(%arg0: i32) -> (i32, i32) {
    %c0_i32 = arith.constant 0 : i32
    %c0_i32_0 = arith.constant 0 : i32
    %c0_i32_1 = arith.constant 0 : i32
    return %c0_i32, %c0_i32_0 : i32, i32
  }
  func.func @transform_9(%arg0: i32) -> (i32, i32) {
    %c0_i32 = arith.constant 0 : i32
    %c0_i32_0 = arith.constant 0 : i32
    %c0_i32_1 = arith.constant 0 : i32
    return %c0_i32, %c0_i32_0 : i32, i32
  }
  func.func @transform_10(%arg0: i32) -> (i32, i32) {
    %c0_i32 = arith.constant 0 : i32
    %c0_i32_0 = arith.constant 0 : i32
    %c0_i32_1 = arith.constant 0 : i32
    return %c0_i32, %c0_i32_0 : i32, i32
  }
  func.func @transform_11(%arg0: i32) -> (i32, i32) {
    %c0_i32 = arith.constant 0 : i32
    %c0_i32_0 = arith.constant 0 : i32
    %c0_i32_1 = arith.constant 0 : i32
    return %c0_i32, %c0_i32_0 : i32, i32
  }
  func.func @transform_12(%arg0: i32) -> (i32, i32) {
    %c0_i32 = arith.constant 0 : i32
    %c0_i32_0 = arith.constant 0 : i32
    %c0_i32_1 = arith.constant 0 : i32
    return %c0_i32, %c0_i32_0 : i32, i32
  }
  func.func @transform_13(%arg0: i32) -> (i32, i32) {
    %c0_i32 = arith.constant 0 : i32
    %c0_i32_0 = arith.constant 0 : i32
    %c0_i32_1 = arith.constant 0 : i32
    return %c0_i32, %c0_i32_0 : i32, i32
  }
  func.func @transform_14(%arg0: i32) -> (i32, i32) {
    %c0_i32 = arith.constant 0 : i32
    %c0_i32_0 = arith.constant 0 : i32
    %c0_i32_1 = arith.constant 0 : i32
    return %c0_i32, %c0_i32_0 : i32, i32
  }
  func.func @transform_15(%arg0: i32) -> (i32, i32) {
    %c0_i32 = arith.constant 0 : i32
    %c0_i32_0 = arith.constant 0 : i32
    %c0_i32_1 = arith.constant 0 : i32
    return %c0_i32, %c0_i32_0 : i32, i32
  }
  func.func @transform_16(%arg0: i32) -> (i32, i32) {
    %c0_i32 = arith.constant 0 : i32
    %c0_i32_0 = arith.constant 0 : i32
    %c0_i32_1 = arith.constant 0 : i32
    return %c0_i32, %c0_i32_0 : i32, i32
  }
  func.func @transform_17(%arg0: i32) -> (i32, i32, i32) {
    %c0_i32 = arith.constant 0 : i32
    %c0_i32_0 = arith.constant 0 : i32
    %c0_i32_1 = arith.constant 0 : i32
    return %arg0, %c0_i32, %c0_i32_0 : i32, i32, i32
  }
}

</mosaic_0001>

<bundles_post_ra>
// kernel: tpu_custom_call.1
= control target key start
LH: loop header
LB: loop body
LE: loop exit
PB: predicated region body
PF: predicated region fallthrough
CT: control target
= control target key end

     0   :  { %s3030_s0 = inlined_call_operand.vmem [shape: f32[8,8,24], index: 0, kind: input, shape index: {}]   ;;  %s3031_s1 = inlined_call_operand.hbm [shape: f32[8,32], index: 1, kind: input, shape index: {}]   ;;  %s3032_s2 = inlined_call_operand.hbm [shape: f32[24,32], index: 2, kind: input, shape index: {}]   ;;  %s3033_s3 = inlined_call_operand.vmem [shape: f32[1,32], index: 3, kind: input, shape index: {}]   ;;  %s3034_s4 = inlined_call_operand.hbm [shape: f32[32,96], index: 4, kind: input, shape index: {}]   ;;  %s3035_s5 = inlined_call_operand.hbm [shape: f32[1,96], index: 5, kind: input, shape index: {}]   ;;  %s3036_s6 = inlined_call_operand.hbm [shape: f32[32,96], index: 6, kind: input, shape index: {}]   ;;  %s3037_s7 = inlined_call_operand.hbm [shape: f32[1,96], index: 7, kind: input, shape index: {}]   ;;  %s3038_s8 = inlined_call_operand.vmem [shape: f32[32,32], index: 8, kind: input, shape index: {}]   ;;  %s3039_s9 = inlined_call_operand.hbm [shape: f32[1,32], index: 9, kind: input, shape index: {}]   ;;  %s3040_s10 = inlined_call_operand.hbm [shape: f32[32,32], index: 10, kind: input, shape index: {}]   ;;  %s3041_s11 = inlined_call_operand.hbm [shape: f32[1,32], index: 11, kind: input, shape index: {}]   ;;  %s3042_s12 = inlined_call_operand.hbm [shape: f32[16,16], index: 12, kind: input, shape index: {}]   ;;  %s3043_s13 = inlined_call_operand.vmem [shape: f32[32,16], index: 13, kind: input, shape index: {}]   ;;  %s3044_s14 = inlined_call_operand.vmem [shape: f32[4,16], index: 14, kind: input, shape index: {}]   ;;  %s3045_s15 = inlined_call_operand.vmem [shape: f32[16,8], index: 15, kind: input, shape index: {}]   ;;  %s3046_s16 = inlined_call_operand.vmem [shape: f32[1,8], index: 16, kind: input, shape index: {}]   ;;  %s3047_s17 = inlined_call_operand.hbm [shape: f32[8,8,40], index: 17, kind: output, shape index: {}]  }
   0x1   :  { %3066 = sst [smem:[#allocation35_spill]] %s3030_s0 }
   0x2   :  { %3067 = sst [smem:[#allocation36_spill]] %s3031_s1 }
   0x3   :  { %3068 = sst [smem:[#allocation37_spill]] %s3032_s2 }
   0x4   :  { %3069 = sst [smem:[#allocation38_spill]] %s3034_s4 }
   0x5   :  { %3070 = sst [smem:[#allocation39_spill]] %s3044_s14 }
   0x6   :  { %3071 = sst [smem:[#allocation40_spill]] %s3045_s15 }
   0x7   :  { %3072 = sst [smem:[#allocation41_spill]] %s3046_s16 }
   0x8   :  { %3073 = sst [smem:[#allocation42_spill]] %s3047_s17 }
   0x9   :  { %22 = vsyncpa [#allocation4], 0 }
   0xa   :  { %23 = vsyncpa [#allocation7], 0 }
   0xb   :  { %24 = vsyncpa [#allocation10], 0 }
   0xc   :  { %25 = vsyncpa [#allocation13], 0 }
   0xd   :  { %26 = vsyncpa [#allocation16], 0 }
   0xe   :  { %27 = vsyncpa [#allocation19], 0 }
   0xf   :  { %28 = vsyncpa [#allocation5], 0 }
  0x10   :  { %30 = vsyncpa [#allocation5 + $0x1], 0  ;;  %s2561_s24 = smov 0   ;;  %s2563_s25 = smov 0  }
  0x11   :  { %s2565_s26 = smov 0   ;;  %s2567_s27 = smov 0  }
  0x12 LB: > { %3074 = sst [smem:[#allocation28_spill]] %s2435_s24  ;;  %s2582_s28 = sadd.s32 4294967295, %s2447_s27   ;;  %s2447_s27 = sphi %s2567_s27, %s3117_s27   ;;  %s2443_s26 = sphi %s2565_s26, %s3122_s26   ;;  %s2439_s25 = sphi %s2563_s25, %s3121_s25   ;;  %s2435_s24 = sphi %s2561_s24, %s3120_s24  }
  0x13   : > { %3075 = sst [smem:[#allocation29_spill]] %s2443_s26  ;;  %s1707_s29 = sadd.s32 4294967294, %s2447_s27  }
  0x14   : > { %3076 = sst [smem:[#allocation30_spill]] %s2447_s27  ;;  %s2586_s0 = sadd.s32 1, %s2447_s27  }
  0x15   : > { %3077 = sst [smem:[#allocation31_spill]] %s2586_s0  ;;  %s405_s30 = sadd.s32 1, %s2443_s26 }
  0x16   : > { %s402_s18 = ssub.s32 %s2447_s27, %s2586_s0  ;;  %p415_p0 = scmp.ne.s32.totalorder %s2443_s26, %s2439_s25 }
  0x17   : > { %p403_p1 = scmp.eq.s32.totalorder %s402_s18, 0  ;;  %p416_p2 = scmp.eq.s32.totalorder %s2582_s28, 7 }
  0x18   : > { %p421_p3 = scmp.ne.s32.totalorder %s2439_s25, %s2435_s24  ;;  %p422_p4 = scmp.eq.s32.totalorder %s1707_s29, 7 }
  0x19   : > { %s2597_s19 = scalar_select %p403_p1, %s2443_s26, %s405_s30  }
  0x1a   : > { %p2599_p5 = por %p416_p2, %p415_p0  ;;  %p2603_p6 = por %p422_p4, %p421_p3 }
  0x1b   : > { %3078 = sst [smem:[#allocation32_spill]] %s2597_s19  ;;  %p1708_p7 = scmp.ge.s32.totalorder %s2447_s27, 1 }
  0x1c   : > { %s3079_s1 = scalar_select %p2599_p5, 1, 0 }
  0x1d   : > { %s3081_s20 = scalar_select %p2603_p6, 1, 0 }
  0x1e   : > { %3080 = sst [smem:[#allocation33_spill]] %s3079_s1  ;;  %p429_p8 = scmp.lt.s32.totalorder %s2447_s27, 9 }
  0x1f   : > { %3082 = sst [smem:[#allocation34_spill]] %s3081_s20  ;;  %p3056_p10 = scmp.eq.s32.totalorder %s2582_s28, 0 }
  0x20   : > { %p2611_p11 = pnand %p1708_p7, %p429_p8  ;;  %s2449_s22 = smov [#allocation6]  }
  0x21   : > { %s452_s23 = sshll.u32 %s2449_s22, 4  ;;  %s2450_s30 = smov [#allocation9]   ;;  %s2617_s23 = int_to_ptr.vmem [resolvable:$true] %s452_s23 }
  0x22   : > { %s3083_s21 = scalar_select %p2611_p11, 1, 0 }
  0x23   : > { %p1960_p12 = pneg %p2611_p11  ;;  %s482_s18 = sshll.u32 %s2450_s30, 4  ;;  %s2625_s18 = int_to_ptr.vmem [resolvable:$true] %s482_s18 }
  0x24   : > { %s2451_s19 = smov [#allocation12]   ;;  %s3085_s2 = sld [smem:[#allocation37_spill]] }
  0x25   : > { %p2621_p13 = pnand %p3056_p10, %p1960_p12  ;;  %s2627_s26 = sshll.u32 %s2451_s19, 4  ;;  %s507_s26 = int_to_ptr.vmem [resolvable:$true] %s2627_s26 }
  0x27   : > { %p2637_p1 = pneg %p2621_p13 }
  0x2a   : > { %s2081_s22 = scalar_lea.hbm %s3085_s2, 384 }
  0x2b   : > { %p2082_p0 = scmp.ne.s32.totalorder %s3085_s2, %s2081_s22  ;;  %p2088_p4 = scmp.lt.u32.totalorder %s2081_s22, %s3085_s2 }
  0x2d   : > { %p2084_p2 = pnand %p2637_p1, %p2082_p0 }
  0x2f   : > { %p2085_p3 = pneg %p2084_p2 }
  0x31   : > { %p2090_p7 = pnand %p2088_p4, %p2085_p3 }
  0x33   : > { %2093 = shalt.err (!%p2090_p7)
}
  0x34   : > { %s2094_s24 = scalar_lea.vmem %s2617_s23, 384  ;;  %p2102_p10 = scmp.lt.s32.totalorder %s2617_s23, %s2617_s23 }
  0x35   : > { %p2095_p8 = scmp.ne.s32.totalorder %s2617_s23, %s2094_s24  ;;  %p2103_p6 = scmp.lt.s32.totalorder %s2094_s24, %s2094_s24 }
  0x37   : > { %p2097_p12 = pnand %p2095_p8, %p2637_p1  ;;  %p2104_p0 = por %p2103_p6, %p2102_p10 }
  0x39   : > { %p2098_p9 = pneg %p2097_p12 }
  0x3b   : > { %p2105_p2 = pnand %p2104_p0, %p2098_p9 }
  0x3d   : > { %2108 = shalt.err (!%p2105_p2)
}
  0x3e   : > { %s3062_s27 = smov 128   ;;  %s3064_s0 = smov 8  }
  0x3f   : > { %1966 = dma.hbm_to_vmem [thread:$0]  (!%p2621_p13), %s3085_s2, 384, %s2617_s23, [#allocation7], %s3062_s27, %s3062_s27, %s3064_s0  }
  0x40   : > { %s2109_s24 = scalar_lea.hbm %s3035_s5, 16 }
  0x41   : > { %p2110_p6 = scmp.ne.s32.totalorder %s3035_s5, %s2109_s24  ;;  %p2116_p3 = scmp.lt.u32.totalorder %s2109_s24, %s3035_s5 }
  0x43   : > { %p2112_p9 = pnand %p2110_p6, %p2637_p1 }
  0x45   : > { %p2113_p10 = pneg %p2112_p9 }
  0x47   : > { %p2118_p4 = pnand %p2116_p3, %p2113_p10 }
  0x49   : > { %2121 = shalt.err (!%p2118_p4)
}
  0x4a   : > { %s2122_s23 = scalar_lea.vmem %s2625_s18, 16  ;;  %s2129_s16 = scalar_lea.vmem %s2625_s18, 32 }
  0x4b   : > { %p2123_p7 = scmp.ne.s32.totalorder %s2625_s18, %s2122_s23  ;;  %p2130_p0 = scmp.lt.s32.totalorder %s2625_s18, %s2625_s18 }
  0x4c   : > { %p2131_p2 = scmp.lt.s32.totalorder %s2129_s16, %s2122_s23 }
  0x4d   : > { %p2125_p8 = pnand %p2123_p7, %p2637_p1 }
  0x4e   : > { %p2132_p6 = por %p2131_p2, %p2130_p0 }
  0x4f   : > { %p2126_p12 = pneg %p2125_p8 }
  0x51   : > { %p2133_p9 = pnand %p2132_p6, %p2126_p12 }
  0x53   : > { %2136 = shalt.err (!%p2133_p9)
}
  0x54   : > { %1972 = dma.hbm_to_vmem [thread:$0]  (!%p2621_p13), %s3035_s5, 16, %s2625_s18, [#allocation10]  }
  0x55   : > { %s2137_s22 = scalar_lea.hbm %s3037_s7, 16 }
  0x56   : > { %p2138_p10 = scmp.ne.s32.totalorder %s3037_s7, %s2137_s22  ;;  %p2144_p7 = scmp.lt.u32.totalorder %s2137_s22, %s3037_s7 }
  0x58   : > { %p2140_p3 = pnand %p2138_p10, %p2637_p1 }
  0x5a   : > { %p2141_p4 = pneg %p2140_p3 }
  0x5c   : > { %p2146_p8 = pnand %p2144_p7, %p2141_p4 }
  0x5e   : > { %2149 = shalt.err (!%p2146_p8)
}
  0x5f   : > { %s2150_s16 = scalar_lea.vmem %s507_s26, 16  ;;  %s2157_s18 = scalar_lea.vmem %s507_s26, 32 }
  0x60   : > { %p2151_p12 = scmp.ne.s32.totalorder %s507_s26, %s2150_s16  ;;  %p2158_p6 = scmp.lt.s32.totalorder %s507_s26, %s507_s26 }
  0x61   : > { %p2159_p9 = scmp.lt.s32.totalorder %s2157_s18, %s2150_s16 }
  0x62   : > { %p2153_p0 = pnand %p2151_p12, %p2637_p1 }
  0x63   : > { %p2160_p5 = por %p2159_p9, %p2158_p6 }
  0x64   : > { %p2154_p2 = pneg %p2153_p0 }
  0x66   : > { %p2161_p11 = pnand %p2160_p5, %p2154_p2 }
  0x68   : > { %2164 = shalt.err (!%p2161_p11)
}
  0x69   : > { %1978 = dma.hbm_to_vmem [thread:$0]  (!%p2621_p13), %s3037_s7, 16, %s507_s26, [#allocation13]  }
  0x6a   : > { %s2454_s1 = smov [#allocation15]   ;;  %s2455_s22 = smov [#allocation3]  }
  0x6b   : > { %s530_s20 = sshll.u32 %s2454_s1, 4  ;;  %s442_s30 = sshll.u32 %s2455_s22, 4  ;;  %s531_s20 = int_to_ptr.vmem [resolvable:$true] %s530_s20  ;;  %s443_s30 = int_to_ptr.vmem [resolvable:$true] %s442_s30 }
  0x6c   : > { %s2165_s23 = scalar_lea.hbm %s3040_s10, 512 }
  0x6d   : > { %p2166_p5 = scmp.ne.s32.totalorder %s3040_s10, %s2165_s23  ;;  %p2172_p3 = scmp.lt.u32.totalorder %s2165_s23, %s3040_s10 }
  0x6f   : > { %p2168_p11 = pnand %p2166_p5, %p2637_p1 }
  0x71   : > { %p2169_p10 = pneg %p2168_p11 }
  0x73   : > { %p2174_p4 = pnand %p2172_p3, %p2169_p10 }
  0x75   : > { %2177 = shalt.err (!%p2174_p4)
}
  0x76   : > { %s2178_s26 = scalar_lea.vmem %s531_s20, 512  ;;  %p2186_p0 = scmp.lt.s32.totalorder %s531_s20, %s531_s20 }
  0x77   : > { %p2179_p7 = scmp.ne.s32.totalorder %s531_s20, %s2178_s26  ;;  %p2187_p2 = scmp.lt.s32.totalorder %s2178_s26, %s2178_s26 }
  0x79   : > { %p2181_p8 = pnand %p2179_p7, %p2637_p1  ;;  %p2188_p6 = por %p2187_p2, %p2186_p0 }
  0x7b   : > { %p2182_p12 = pneg %p2181_p8 }
  0x7d   : > { %p2189_p9 = pnand %p2188_p6, %p2182_p12 }
  0x7f   : > { %2192 = shalt.err (!%p2189_p9)
}
  0x80   : > { %s3087_s15 = smov 128   ;;  %s3088_s24 = sld [smem:[#allocation36_spill]] }
  0x81   : > { %1984 = dma.hbm_to_vmem [thread:$0]  (!%p2621_p13), %s3040_s10, 512, %s531_s20, [#allocation16], %s3087_s15, %s3087_s15, %s3064_s0  }
  0x86   : > { %s3089_s23 = smov %s3088_s24  ;;  %s2193_s16 = scalar_lea.hbm %s3088_s24, 128 }
  0x87   : > { %p2194_p5 = scmp.ne.s32.totalorder %s3089_s23, %s2193_s16  ;;  %p2200_p3 = scmp.lt.u32.totalorder %s2193_s16, %s3089_s23 }
  0x89   : > { %p2196_p11 = pnand %p2194_p5, %p2637_p1 }
  0x8b   : > { %p2197_p10 = pneg %p2196_p11 }
  0x8d   : > { %p2202_p4 = pnand %p2200_p3, %p2197_p10 }
  0x8f   : > { %2205 = shalt.err (!%p2202_p4)
}
  0x90   : > { %s2206_s27 = scalar_lea.vmem %s443_s30, 128  ;;  %p2214_p0 = scmp.lt.s32.totalorder %s443_s30, %s443_s30 }
  0x91   : > { %p2207_p7 = scmp.ne.s32.totalorder %s443_s30, %s2206_s27  ;;  %p2215_p2 = scmp.lt.s32.totalorder %s2206_s27, %s2206_s27 }
  0x93   : > { %p2209_p8 = pnand %p2207_p7, %p2637_p1  ;;  %p2216_p6 = por %p2215_p2, %p2214_p0 }
  0x95   : > { %p2210_p12 = pneg %p2209_p8 }
  0x97   : > { %p2217_p9 = pnand %p2216_p6, %p2210_p12 }
  0x99   : > { %2220 = shalt.err (!%p2217_p9)
}
  0x9a   : > { %1963 = dma.hbm_to_vmem [thread:$0]  (!%p2621_p13), %s3089_s23, 128, %s443_s30, [#allocation4]  }
  0x9b   : > { %s2456_s2 = smov [#allocation8]   ;;  %s2457_s19 = smov [#allocation11]  }
  0x9c   : > { %s468_s22 = sshll.u32 %s2456_s2, 4  ;;  %s492_s24 = sshll.u32 %s2457_s19, 4  ;;  %s469_s22 = int_to_ptr.vmem [resolvable:$true] %s468_s22  ;;  %s493_s24 = int_to_ptr.vmem [resolvable:$true] %s492_s24 }
  0x9d   : > { %s3090_s4 = sld [smem:[#allocation38_spill]] }
  0xa3   : > { %s2221_s14 = scalar_lea.hbm %s3090_s4, 512 }
  0xa4   : > { %p2222_p5 = scmp.ne.s32.totalorder %s3090_s4, %s2221_s14  ;;  %p2228_p3 = scmp.lt.u32.totalorder %s2221_s14, %s3090_s4 }
  0xa6   : > { %p2224_p11 = pnand %p2222_p5, %p2637_p1 }
  0xa8   : > { %p2225_p10 = pneg %p2224_p11 }
  0xaa   : > { %p2230_p4 = pnand %p2228_p3, %p2225_p10 }
  0xac   : > { %2233 = shalt.err (!%p2230_p4)
}
  0xad   : > { %s2234_s30 = scalar_lea.vmem %s469_s22, 512  ;;  %p2242_p0 = scmp.lt.s32.totalorder %s469_s22, %s469_s22 }
  0xae   : > { %p2235_p7 = scmp.ne.s32.totalorder %s469_s22, %s2234_s30  ;;  %p2243_p2 = scmp.lt.s32.totalorder %s2234_s30, %s2234_s30 }
  0xb0   : > { %p2237_p8 = pnand %p2235_p7, %p2637_p1  ;;  %p2244_p6 = por %p2243_p2, %p2242_p0 }
  0xb2   : > { %p2238_p12 = pneg %p2237_p8 }
  0xb4   : > { %p2245_p9 = pnand %p2244_p6, %p2238_p12 }
  0xb6   : > { %2248 = shalt.err (!%p2245_p9)
}
  0xb7   : > { %s3091_s1 = smov 8   ;;  %s2249_s18 = scalar_lea.hbm %s3036_s6, 512 }
  0xb8   : > { %1969 = dma.hbm_to_vmem [thread:$0]  (!%p2621_p13), %s3090_s4, 512, %s469_s22, [#allocation7], %s3087_s15, %s3087_s15, %s3091_s1  }
  0xb9   : > { %p2250_p5 = scmp.ne.s32.totalorder %s3036_s6, %s2249_s18  ;;  %p2256_p3 = scmp.lt.u32.totalorder %s2249_s18, %s3036_s6 }
  0xbb   : > { %p2252_p11 = pnand %p2250_p5, %p2637_p1 }
  0xbd   : > { %p2253_p10 = pneg %p2252_p11 }
  0xbf   : > { %p2258_p4 = pnand %p2256_p3, %p2253_p10 }
  0xc1   : > { %2261 = shalt.err (!%p2258_p4)
}
  0xc2   : > { %s2262_s30 = scalar_lea.vmem %s493_s24, 512  ;;  %p2270_p0 = scmp.lt.s32.totalorder %s493_s24, %s493_s24 }
  0xc3   : > { %p2263_p7 = scmp.ne.s32.totalorder %s493_s24, %s2262_s30  ;;  %p2271_p2 = scmp.lt.s32.totalorder %s2262_s30, %s2262_s30 }
  0xc5   : > { %p2265_p8 = pnand %p2263_p7, %p2637_p1  ;;  %p2272_p6 = por %p2271_p2, %p2270_p0 }
  0xc7   : > { %p2266_p12 = pneg %p2265_p8 }
  0xc9   : > { %p2273_p9 = pnand %p2272_p6, %p2266_p12 }
  0xcb   : > { %2276 = shalt.err (!%p2273_p9)
}
  0xcc   : > { %1975 = dma.hbm_to_vmem [thread:$0]  (!%p2621_p13), %s3036_s6, 512, %s493_s24, [#allocation10], %s3087_s15, %s3087_s15, %s3091_s1  }
  0xcd   : > { %s2458_s2 = smov [#allocation14]   ;;  %s2459_s16 = smov [#allocation17]  }
  0xce   : > { %s520_s19 = sshll.u32 %s2458_s2, 4  ;;  %s544_s18 = sshll.u32 %s2459_s16, 4  ;;  %s521_s19 = int_to_ptr.vmem [resolvable:$true] %s520_s19  ;;  %s545_s18 = int_to_ptr.vmem [resolvable:$true] %s544_s18 }
  0xcf   : > { %s2277_s27 = scalar_lea.hbm %s3039_s9, 16 }
  0xd0   : > { %p2278_p5 = scmp.ne.s32.totalorder %s3039_s9, %s2277_s27  ;;  %p2284_p3 = scmp.lt.u32.totalorder %s2277_s27, %s3039_s9 }
  0xd2   : > { %p2280_p11 = pnand %p2278_p5, %p2637_p1 }
  0xd4   : > { %p2281_p10 = pneg %p2280_p11 }
  0xd6   : > { %p2286_p4 = pnand %p2284_p3, %p2281_p10 }
  0xd8   : > { %2289 = shalt.err (!%p2286_p4)
}
  0xd9   : > { %s2290_s24 = scalar_lea.vmem %s521_s19, 16  ;;  %s2297_s0 = scalar_lea.vmem %s521_s19, 32 }
  0xda   : > { %p2291_p7 = scmp.ne.s32.totalorder %s521_s19, %s2290_s24  ;;  %p2298_p0 = scmp.lt.s32.totalorder %s521_s19, %s521_s19 }
  0xdb   : > { %p2299_p2 = scmp.lt.s32.totalorder %s2297_s0, %s2290_s24 }
  0xdc   : > { %p2293_p8 = pnand %p2291_p7, %p2637_p1 }
  0xdd   : > { %p2300_p6 = por %p2299_p2, %p2298_p0 }
  0xde   : > { %p2294_p12 = pneg %p2293_p8 }
  0xe0   : > { %p2301_p9 = pnand %p2300_p6, %p2294_p12 }
  0xe2   : > { %2304 = shalt.err (!%p2301_p9)
}
  0xe3   : > { %1981 = dma.hbm_to_vmem [thread:$0]  (!%p2621_p13), %s3039_s9, 16, %s521_s19, [#allocation13]  }
  0xe4   : > { %s2305_s26 = scalar_lea.hbm %s3041_s11, 16 }
  0xe5   : > { %p2306_p5 = scmp.ne.s32.totalorder %s3041_s11, %s2305_s26  ;;  %p2312_p3 = scmp.lt.u32.totalorder %s2305_s26, %s3041_s11 }
  0xe7   : > { %p2308_p11 = pnand %p2306_p5, %p2637_p1 }
  0xe9   : > { %p2309_p10 = pneg %p2308_p11 }
  0xeb   : > { %p2314_p4 = pnand %p2312_p3, %p2309_p10 }
  0xed   : > { %2317 = shalt.err (!%p2314_p4)
}
  0xee   : > { %s2318_s24 = scalar_lea.vmem %s545_s18, 16  ;;  %s2325_s19 = scalar_lea.vmem %s545_s18, 32 }
  0xef   : > { %p2319_p7 = scmp.ne.s32.totalorder %s545_s18, %s2318_s24  ;;  %p2326_p0 = scmp.lt.s32.totalorder %s545_s18, %s545_s18 }
  0xf0   : > { %p2327_p2 = scmp.lt.s32.totalorder %s2325_s19, %s2318_s24 }
  0xf1   : > { %p2321_p8 = pnand %p2319_p7, %p2637_p1 }
  0xf2   : > { %p2328_p6 = por %p2327_p2, %p2326_p0 }
  0xf3   : > { %p2322_p12 = pneg %p2321_p8 }
  0xf5   : > { %p2329_p9 = pnand %p2328_p6, %p2322_p12 }
  0xf7   : > { %2332 = shalt.err (!%p2329_p9)
}
  0xf8   : > { %1987 = dma.hbm_to_vmem [thread:$0]  (!%p2621_p13), %s3041_s11, 16, %s545_s18, [#allocation16]  }
  0xf9   : > { %s2460_s16 = smov [#allocation18]   ;;  %s2333_s27 = scalar_lea.hbm %s3042_s12, 256 }
  0xfa   : > { %s554_s4 = sshll.u32 %s2460_s16, 4  ;;  %p2334_p5 = scmp.ne.s32.totalorder %s3042_s12, %s2333_s27  ;;  %s555_s4 = int_to_ptr.vmem [resolvable:$true] %s554_s4 }
  0xfb   : > { %p2340_p3 = scmp.lt.u32.totalorder %s2333_s27, %s3042_s12 }
  0xfc   : > { %p2336_p11 = pnand %p2334_p5, %p2637_p1 }
  0xfe   : > { %p2337_p10 = pneg %p2336_p11 }
 0x100   : > { %p2342_p4 = pnand %p2340_p3, %p2337_p10 }
 0x102   : > { %2345 = shalt.err (!%p2342_p4)
}
 0x103   : > { %s2346_s18 = scalar_lea.vmem %s555_s4, 256  ;;  %p2354_p0 = scmp.lt.s32.totalorder %s555_s4, %s555_s4 }
 0x104   : > { %p2347_p7 = scmp.ne.s32.totalorder %s555_s4, %s2346_s18  ;;  %p2355_p2 = scmp.lt.s32.totalorder %s2346_s18, %s2346_s18 }
 0x106   : > { %p2349_p8 = pnand %p2347_p7, %p2637_p1  ;;  %p2356_p6 = por %p2355_p2, %p2354_p0 }
 0x108   : > { %p2350_p12 = pneg %p2349_p8 }
 0x10a   : > { %p2357_p9 = pnand %p2356_p6, %p2350_p12 }
 0x10c   : > { %2360 = shalt.err (!%p2357_p9)
}
 0x10d   : > { %1990 = dma.hbm_to_vmem [thread:$0]  (!%p2621_p13), %s3042_s12, 256, %s555_s4, [#allocation19], %s3087_s15, %s3087_s15, %s3091_s1  }
 0x10e   : > { %p3092_p5 = scmp.ne.s32.totalorder %s3083_s21, 0 }
 0x10f   : > { %p3093_p1 = scmp.eq.s32.totalorder (!%p3092_p5), %s2582_s28, 0 }
 0x110   : > { %589 = sbr.rel (%p3092_p5) target bundleno = 3004 (0xbbc), region = 88 }
 0x117   : > { %2406 = dma.done.wait (%p3093_p1), [#allocation4], 128   ;;  %p3094_p11 = pmov %p3093_p1 }
 0x118   : > { %p3095_p10 = pmov %p3093_p1 }
 0x119   : > { %2408 = vsyncadd (%p3094_p11), [#allocation4], 4294967168 }
 0x11a   : > { %2410 = dma.done.wait (%p3095_p10), [#allocation7], 896   ;;  %p3096_p3 = pmov %p3093_p1 }
 0x11b   : > { %p3097_p4 = pmov %p3093_p1 }
 0x11c   : > { %2412 = vsyncadd (%p3096_p3), [#allocation7], 4294966400 }
 0x11d   : > { %2414 = dma.done.wait (%p3097_p4), [#allocation10], 528   ;;  %p3098_p13 = pmov %p3093_p1 }
 0x11e   : > { %p3099_p7 = pmov %p3093_p1 }
 0x11f   : > { %2416 = vsyncadd (%p3098_p13), [#allocation10], 4294966768 }
 0x120   : > { %2418 = dma.done.wait (%p3099_p7), [#allocation13], 32   ;;  %p3100_p8 = pmov %p3093_p1 }
 0x121   : > { %p3101_p12 = pmov %p3093_p1 }
 0x122   : > { %2420 = vsyncadd (%p3100_p8), [#allocation13], 4294967264 }
 0x123   : > { %2422 = dma.done.wait (%p3101_p12), [#allocation16], 528   ;;  %p3102_p0 = pmov %p3093_p1 }
 0x125   : > { %2424 = vsyncadd (%p3102_p0), [#allocation16], 4294966768  ;;  %p3103_p2 = pmov %p3102_p0 }
 0x126   : > { %p3104_p6 = pmov %p3102_p0 }
 0x127   : > { %2426 = dma.done.wait (%p3103_p2), [#allocation19], 256  }
 0x128   : > { %2428 = vsyncadd (%p3104_p6), [#allocation19], 4294967040  ;;  %s673_s17 = sand.u32 1, %s2439_s25   ;;  %p676_p9 = scmp.lt.s32.totalorder %s2582_s28, 7 }
 0x129   : > { %s2872_s21 = sshll.u32 %s673_s17, 3  ;;  %s3105_s16 = sld [smem:[#allocation35_spill]] }
 0x12a   : > { %s677_s29 = scalar_select %p676_p9, %s2582_s28, 7 }
 0x12b   : > { %s675_s14 = scalar_lea.vmem [#allocation20], %s2872_s21  ;;  %p3106_p5 = scmp.ne.s32.totalorder %s2582_s28, 0 }
 0x12c   : > { %s1732_s15 = sshll.u32 %s677_s29, 3  ;;  %v684_v0 = vld [vmem:[#allocation3] sm:$0xff] (!%p3106_p5)  ;;  %vm685_vm0 = vcmask (!%p3106_p5), 261120  }
 0x12d   : > { %683 = sbr.rel (%p3106_p5) target bundleno = 308 (0x134), region = 132  ;;  %686 = vst.msk [vmem:[#allocation2] sm:$0xff] (!%p3106_p5), %vm685_vm0, %v684_v0 }
 0x12f   : > { %s679_s4 = scalar_lea.vmem %s3105_s16, %s1732_s15 }
 0x134 PF: > { %v689_v1 = vld [vmem:[#allocation6] sm:$0xff]  ;;  %v690_v2 = vld [vmem:[#allocation6 + $0x8] sm:$0xff]  ;;  %v2461_v3 = vmov 0.0|0.0   ;;  %vm2462_vm1 = vmmov 0   ;;  %v2463_v5 = vmov 0.0   ;;  %v774_v8 = vld [vmem:[#allocation8] sm:$0xff] }
 0x135   : > { %1877 = vmatprep.subr.bf16.mxu0 %v2461_v3  ;;  %v1878_v4 = vpack.c.bf16 %v690_v2, %v689_v1  ;;  %1800 = vmatprep.mubr.msk.f32.mxu0 %vm2462_vm1, %v2463_v5  ;;  %v859_v6 = vld [vmem:[#allocation11] sm:$0xff]  ;;  %v860_v7 = vld [vmem:[#allocation11 + $0x8] sm:$0xff]  ;;  %v691_v10 = vld [vmem:[#allocation6 + $0x10] sm:$0xff]  ;;  %vm699_vm2 = vcmask 195584   ;;  %vm785_vm3 = vcmask 261120   ;;  %s2464_s20 = smov 64  }
 0x136   : > { %1880 = vmatprep.subr.bf16.mxu1 %v2461_v3  ;;  %1811 = vmatprep.mubr.msk.f32.mxu1 %vm2462_vm1, %v2463_v5  ;;  %v775_v9 = vld [vmem:[#allocation8 + $0x8] sm:$0xff]  ;;  %v687_v12 = vld [vmem:[%s679_s4] sm:$0xff]  ;;  %v1887_v13 = vpack.c.bf16 %v860_v7, %v859_v6  ;;  %v776_v18 = vld [vmem:[#allocation8 + $0x10] sm:$0xff]  ;;  %s2465_s1 = smov 96   ;;  %s2466_s2 = smov 32   ;;  %vm1161_vm4 = vcmask 130048  }
 0x137   : > { %1879 = vmatpush3.bf16.msra.mxu0 %v1878_v4  ;;  %v1881_v11 = vpack.c.bf16 %v775_v9, %v774_v8  ;;  %v861_v14 = vld [vmem:[#allocation11 + $0x10] sm:$0xff]  ;;  %v862_v15 = vld [vmem:[#allocation11 + $0x18] sm:$0xff]  ;;  %v1738_v26 = vld [vmem:[#allocation12] ss:$0 sm:$0xff]  ;;  %s2467_s18 = smov 112   ;;  %s2468_s19 = smov 16  }
 0x138   : > { %1798 = vmatprep.subr.mxu0 %v2463_v5  ;;  %v1890_v16 = vpack.c.bf16 %v862_v15, %v861_v14  ;;  %v688_v17 = vld [vmem:[#allocation2] sm:$0xff]  ;;  %v1736_v30 = vld [vmem:[#allocation9] ss:$0 sm:$0xff]  ;;  %v979_v45 = vld [vmem:[%s3038_s8 + $0x10] sm:$0xff]  ;;  %s3107_s15 = sld [smem:[#allocation39_spill]]  ;;  %vm1371_vm6 = vcmask 1043456  }
 0x139   : > { %1882 = vmatpush3.bf16.msra.mxu1 %v1881_v11  ;;  %v777_v19 = vld [vmem:[#allocation8 + $0x18] sm:$0xff]  ;;  %v978_v44 = vld [vmem:[%s3038_s8 + $0x8] sm:$0xff]  ;;  %v980_v47 = vld [vmem:[%s3038_s8 + $0x18] sm:$0xff]  ;;  %vm1367_vm8 = vcmask 31744   ;;  %s3108_s4 = sld [smem:[#allocation40_spill]]  ;;  %s3109_s22 = sld [smem:[#allocation41_spill]] }
 0x13a   : > { %1883 = vmatprep.subr.bf16.mxu1 %v2461_v3  ;;  %v1884_v20 = vpack.c.bf16 %v777_v19, %v776_v18  ;;  %v1734_v21 = vld [vmem:[%s3033_s3] ss:$0 sm:$0xff]  ;;  %v1896_v48 = vpack.c.bf16 %v980_v47, %v979_v45  ;;  %v1061_v53 = vld [vmem:[#allocation15] sm:$0xff]  ;;  %v1062_v54 = vld [vmem:[#allocation15 + $0x8] sm:$0xff]  ;;  %s3110_s24 = sld [smem:[#allocation33_spill]]  ;;  %vm1532_vm9 = vcmask 64512  }
 0x13b   : > { %1799 = vmatpush3.msra.mxu0 %v691_v10  ;;  %v977_v43 = vld [vmem:[%s3038_s8] sm:$0xff]  ;;  %v1899_v57 = vpack.c.bf16 %v1062_v54, %v1061_v53  ;;  %v1218_v60 = vld [vmem:[%s3043_s13 + $0x8] sm:$0xff]  ;;  %v1219_v62 = vld [vmem:[%s3043_s13 + $0x10] sm:$0xff]  ;;  %vm1534_vm10 = vcmask 326656   ;;  %s2470_s16 = smov [#allocation20]  }
 0x13c   : > { %1801 = vmatmul.mubr.msk.f32.vlgmr.msra.gmra.mrb[0].mxu0 %vm699_vm2, %v687_v12  ;;  %1886 = vmatprep.subr.bf16.mxu0 %v2461_v3  ;;  %v1893_v46 = vpack.c.bf16 %v978_v44, %v977_v43  ;;  %v1217_v59 = vld [vmem:[%s3043_s13] sm:$0xff]  ;;  %v1220_v63 = vld [vmem:[%s3043_s13 + $0x18] sm:$0xff]  ;;  %v1741_v7 = vld [vmem:[#allocation14] ss:$0 sm:$0xff]  ;;  %s2365_s26 = sshll.u32 %s2470_s16, 4  ;;  %s2366_s26 = int_to_ptr.vmem [resolvable:$false] %s2365_s26 }
 0x13d   : > { %1888 = vmatpush3.bf16.msra.mxu0 %v1887_v13  ;;  %1822 = vmatprep.mubr.msk.f32.mxu0 %vm2462_vm1, %v2463_v5  ;;  %v1905_v61 = vpack.c.bf16 %v1218_v60, %v1217_v59  ;;  %v1908_v1 = vpack.c.bf16 %v1220_v63, %v1219_v62  ;;  %v1063_v2 = vld [vmem:[#allocation15 + $0x10] sm:$0xff]  ;;  %v1064_v4 = vld [vmem:[#allocation15 + $0x18] sm:$0xff]  ;;  %v1743_v14 = vld [vmem:[#allocation17] ss:$0 sm:$0xff]  ;;  %s2367_s27 = scalar_lea.vmem %s2366_s26, 256 }
 0x13e   : > { %1889 = vmatprep.subr.bf16.mxu0 %v2461_v3  ;;  %1885 = vmatpush3.bf16.msra.mxu1 %v1884_v20  ;;  %v1902_v6 = vpack.c.bf16 %v1064_v4, %v1063_v2  ;;  %v1215_v44 = vld [vmem:[#allocation18] sm:$0xff]  ;;  %v1216_v45 = vld [vmem:[#allocation18 + $0x8] sm:$0xff] }
 0x13f   : > { %1892 = vmatprep.subr.bf16.mxu1 %v2461_v3  ;;  %v1911_v47 = vpack.c.bf16 %v1216_v45, %v1215_v44  ;;  %v1751_v63 = vld [vmem:[%s3109_s22] ss:$0 sm:$0xff] }
 0x140   : > { %p3112_p11 = scmp.ne.s32.totalorder %s3110_s24, 0 }
 0x141   : > { %1891 = vmatpush3.bf16.msra.mxu0 %v1890_v16 }
 0x142   : > { %1898 = vmatprep.subr.bf16.mxu0 %v2461_v3 }
 0x144   : > { %1823 = vmatmul.mubr.msk.f32.vlgmr.msra.gmra.mrb[2].mxu0 %vm785_vm3, %v688_v17 }
 0x145   : > { %1844 = vmatprep.mubr.msk.f32.mxu0 %vm2462_vm1, %v2463_v5  ;;  %1900 = vmatpush3.bf16.msra.mxu0 %v1899_v57 }
 0x146   : > { %1901 = vmatprep.subr.bf16.mxu0 %v2461_v3 }
 0x149   : > { %1903 = vmatpush3.bf16.msra.mxu0 %v1902_v6 }
 0x14a   : > { %1910 = vmatprep.subr.bf16.mxu0 %v2461_v3 }
 0x20f   : > { %v769_v22 = vpop.f32.mrb[0].mxu0 }
 0x210   : > { %v770_v23 = vadd.f32 %v1734_v21, %v769_v22  ;;  %v1802_v24 = vpop.f32.mrb[1].mxu0 }
 0x212   : > { %v773_v25 = vmax.f32 %v770_v23, 0.0 }
 0x214   : > { %1812 = vmatmul.mubr.msk.f32.vlgmr.msra.gmra.mrb[0].mxu1 %vm785_vm3, %v773_v25 }
 0x215   : > { %1833 = vmatprep.mubr.msk.f32.mxu1 %vm2462_vm1, %v2463_v5  ;;  %1894 = vmatpush3.bf16.msra.mxu1 %v1893_v46  ;;  %v1366_v46 = vld [vmem:[%s3107_s15] sm:$0xf]  ;;  %s3111_s15 = sld [smem:[#allocation42_spill]] }
 0x216   : > { %1895 = vmatprep.subr.bf16.mxu1 %v2461_v3 }
 0x217   : > { %v939_v27 = vpop.f32.mrb[2].mxu0 }
 0x218   : > { %v940_v28 = vadd.f32 %v1738_v26, %v939_v27  ;;  %v1824_v29 = vpop.f32.mrb[3].mxu0 }
 0x219   : > { %1897 = vmatpush3.bf16.msra.mxu1 %v1896_v48 }
 0x21a   : > { %951 = vrot.lane.b32.xlu0 %v940_v28, %s2464_s20  ;;  %1904 = vmatprep.subr.bf16.mxu1 %v2461_v3 }
 0x28c   : > { %v952_v38 = vpop.permute.xlu0 %951 }
 0x2e7   : > { %v855_v31 = vpop.f32.mrb[0].mxu1 }
 0x2e8   : > { %v856_v32 = vadd.f32 %v1736_v30, %v855_v31  ;;  %v1813_v33 = vpop.f32.mrb[1].mxu1 }
 0x2e9   : > { %v1174_v33 = vlaneseq }
 0x2ea   : > { %v943_v34 = vadd.f32 %v940_v28, %v856_v32 }
 0x2ec   : > { %v1740_v35 = vmul.f32 -1.442695, %v943_v34 }
 0x2ee   : > { %2069 = vpow2.f32 %v1740_v35  ;;  %v1175_v35 = vshrl.u32 %v1174_v33, 7 }
 0x2f8   : > { %v2070_v36 = vpop.eup %2069 }
 0x2f9   : > { %v947_v37 = vadd.f32 1.0, %v2070_v36  ;;  %v1180_v36 = vand.u32 3, %v1175_v35 }
 0x2fb   : > { %2071 = vrcp.f32 %v947_v37  ;;  %vm1188_vm5 = vcmp.eq.s32.totalorder %v1180_v36, 0 }
 0x305   : > { %v2072_v39 = vpop.eup %2071 }
 0x306   : > { %v954_v40 = vmul.f32 %v2072_v39, %v952_v38  ;;  %v961_v51 = vsub.f32 1.0, %v2072_v39 }
 0x308   : > { %956 = vrot.lane.b32.xlu0 %v954_v40, %s2464_s20 }
 0x37a   : > { %v957_v41 = vpop.permute.xlu0 %956 }
 0x37b   : > { %v959_v42 = vadd.f32 %v957_v41, %v856_v32 }
 0x37d   : > { %2073 = vtanh.f32 %v959_v42 }
 0x387   : > { %v2074_v49 = vpop.eup %2073 }
 0x388   : > { %963 = vrot.lane.b32.xlu1 %v2074_v49, %s2465_s1 }
 0x38c   : > { %967 = vrot.lane.b32.xlu1 %v688_v17, %s2466_s2 }
 0x3fa   : > { %v964_v50 = vpop.permute.xlu1 %963 }
 0x3fb   : > { %v966_v55 = vmul.f32 %v964_v50, %v961_v51  ;;  %v1211_v50 = vand.u32 127, %v1174_v33 }
 0x3fd   : > { %vm1212_vm7 = vcmp.eq.s32.totalorder %v1211_v50, %v1180_v36 }
 0x3fe   : > { %v968_v52 = vpop.permute.xlu1 %967  ;;  %v1746_v51 = vsel %vm1212_vm7, 1.0, %v2463_v5 }
 0x3ff   : > { %v970_v56 = vmul.f32 %v2072_v39, %v968_v52 }
 0x401   : > { %v2918_v58 = vadd.f32 %v970_v56, %v966_v55  ;;  %v1447_v55 = vld [vmem:[%s3108_s4] sm:$0xff]  ;;  %v1448_v56 = vld [vmem:[%s3108_s4 + $0x8] sm:$0xff] }
 0x403   : > { %973 = vrot.lane.b32.xlu0 %v2918_v58, %s2465_s1  ;;  %s2469_s1 = smov 104  }
 0x475   : > { %v974_v0 = vpop.permute.xlu0 %973 }
 0x476   : > { %976 = vst.msk [vmem:[#allocation2] sm:$0xff] %vm785_vm3, %v974_v0  ;;  %1834 = vmatmul.mubr.msk.f32.vlgmr.msra.gmra.mrb[2].mxu1 %vm785_vm3, %v974_v0 }
 0x477   : > { %1906 = vmatpush3.bf16.msra.mxu1 %v1905_v61  ;;  %1855 = vmatprep.mubr.msk.f32.mxu1 %vm2462_vm1, %v2463_v5 }
 0x478   : > { %1907 = vmatprep.subr.bf16.mxu1 %v2461_v3 }
 0x47b   : > { %1909 = vmatpush3.bf16.msra.mxu1 %v1908_v1 }
 0x47c   : > { %1865 = vmatprep.subr.mxu1 %v2463_v5 }
 0x47e   : > { %1856 = vmatmul.mubr.msk.f32.vlgmr.msra.gmra.mrb[4].mxu1 %vm785_vm3, %v974_v0 }
 0x47f   : > { %1867 = vmatprep.mubr.msk.f32.mxu1 %vm2462_vm1, %v2463_v5  ;;  %1866 = vmatpush3.msk.msra.mxu1 %vm1371_vm6, %v1366_v46 }
 0x482   : > { %1868 = vmatmul.mubr.msk.f32.vlgmr.msra.gmra.mrb[6].mxu1 %vm1367_vm8, %v1746_v51 }
 0x549   : > { %v1056_v8 = vpop.f32.mrb[2].mxu1 }
 0x54a   : > { %v1057_v9 = vadd.f32 %v1741_v7, %v1056_v8  ;;  %v1835_v10 = vpop.f32.mrb[3].mxu1 }
 0x54c   : > { %v1060_v11 = vmax.f32 %v1057_v9, 0.0 }
 0x54e   : > { %1845 = vmatmul.mubr.msk.f32.vlgmr.msra.gmra.mrb[4].mxu0 %vm785_vm3, %v1060_v11 }
 0x54f   : > { %1862 = vmatprep.mubr.msk.f32.mxu0 %vm2462_vm1, %v2463_v5  ;;  %1912 = vmatpush3.bf16.msra.mxu0 %v1911_v47 }
 0x550   : > { %1913 = vmatprep.subr.bf16.mxu0 %v2461_v3 }
 0x551   : > { %v2947_v12 = vpop.f32.mrb[4].mxu1 }
 0x552   : > { %v1857_v13 = vpop.f32.mrb[5].mxu1 }
 0x555   : > { %v1441_v3 = vpop.f32.mrb[6].mxu1 }
 0x556   : > { %v1869_v57 = vpop.f32.mrb[7].mxu1 }
 0x621   : > { %v1141_v15 = vpop.f32.mrb[4].mxu0 }
 0x622   : > { %v1142_v16 = vadd.f32 %v1743_v14, %v1141_v15  ;;  %v1846_v17 = vpop.f32.mrb[5].mxu0 }
 0x624   : > { %v1745_v18 = vclamps-f32 %v1142_v16, 20.0 }
 0x626   : > { %v1147_v19 = vmul.f32 1.442695, %v1745_v18 }
 0x628   : > { %2075 = vpow2.f32 %v1147_v19 }
 0x632   : > { %v2076_v20 = vpop.eup %2075 }
 0x633   : > { %v1149_v21 = vadd.f32 1e-07, %v2076_v20 }
 0x635   : > { %v1150_v22 = vadd.f32 1e-07, %v1149_v21 }
 0x637   : > { %2077 = vrcp.f32 %v1150_v22 }
 0x641   : > { %v2078_v23 = vpop.eup %2077 }
 0x642   : > { %1153 = vrot.lane.b32.xlu1 %v2078_v23, %s2467_s18 }
 0x6b4   : > { %v1154_v24 = vpop.permute.xlu1 %1153 }
 0x6b5   : > { %v1156_v25 = vmul.f32 %v1154_v24, %v1142_v16 }
 0x6b7   : > { %1158 = vrot.lane.b32.xlu0 %v1156_v25, %s2468_s19 }
 0x729   : > { %v1159_v26 = vpop.permute.xlu0 %1158 }
 0x72a   : > { %v1162_v27 = vsel %vm1161_vm4, %v1154_v24, %v1159_v26 }
 0x72b   : > { %v1163_v28 = vrot.slane %v1162_v27, 1 }
 0x72d   : > { %v1164_v29 = vadd.f32 %v1163_v28, %v1162_v27 }
 0x72f   : > { %v1165_v30 = vrot.slane %v1164_v29, 2 }
 0x731   : > { %v1166_v31 = vadd.f32 %v1165_v30, %v1164_v29 }
 0x733   : > { %v1167_v32 = vadd.f32 0.9999998, %v1166_v31 }
 0x735   : > { %1169 = vrot.lane.b32.xlu1 %v1167_v32, %s2468_s19 }
 0x7a7   : > { %v1170_v34 = vpop.permute.xlu1 %1169 }
 0x7a8   : > { %2079 = vrcp.f32 %v1170_v34 }
 0x7b2   : > { %v2080_v37 = vpop.eup %2079 }
 0x7b3   : > { %v1173_v38 = vmul.f32 %v2080_v37, %v1166_v31 }
 0x7b5   : > { %v1189_v39 = vsel %vm1188_vm5, %v1173_v38, 0.0 }
 0x7b6   : > { %1191 = vrot.lane.b32.xlu0 %v1189_v39, %s2467_s18 }
 0x828   : > { %v1192_v40 = vpop.permute.xlu0 %1191 }
 0x829   : > { %v1194_v41 = vrot.slane %v1192_v40, 7 }
 0x82b   : > { %1196 = vrot.lane.b32.xlu1 %v1194_v41, %s2468_s19 }
 0x89d   : > { %v1197_v42 = vpop.permute.xlu1 %1196 }
 0x89e   : > { %v1199_v43 = vadd.f32 %v1197_v42, %v1189_v39 }
 0x8a0   : > { %1201 = vrot.lane.b32.xlu0 %v1199_v43, %s2467_s18 }
 0x912   : > { %v1202_v48 = vpop.permute.xlu0 %1201 }
 0x913   : > { %v1204_v49 = vrot.slane %v1202_v48, 6 }
 0x915   : > { %1206 = vrot.lane.b32.xlu1 %v1204_v49, %s2468_s19  ;;  %s1550_s19 = sshll.u32 %s675_s14, 4  ;;  %s2986_s19 = int_to_ptr.vmem [resolvable:$true] %s1550_s19 }
 0x916   : > { %s2361_s2 = scalar_lea.vmem %s2986_s19, 128  ;;  %p2368_p4 = scmp.lt.s32.totalorder %s2986_s19, %s2366_s26 }
 0x917   : > { %p2362_p1 = scmp.ne.s32.totalorder %s2986_s19, %s2361_s2  ;;  %p2369_p13 = scmp.lt.s32.totalorder %s2367_s27, %s2361_s2 }
 0x919   : > { %1529 = vrot.lane.b32.xlu1 %v2918_v58, %s2469_s1  ;;  %v1914_v58 = vpack.c.bf16 %v1448_v56, %v1447_v55  ;;  %p2363_p10 = pnand %p2362_p1, %p3112_p11  ;;  %p2370_p7 = por %p2369_p13, %p2368_p4 }
 0x91b   : > { %p2364_p3 = pneg %p2363_p10 }
 0x91d   : > { %p2371_p8 = pnand %p2370_p7, %p2364_p3 }
 0x987   : > { %v1207_v52 = vpop.permute.xlu1 %1206 }
 0x988   : > { %v1209_v53 = vadd.f32 %v1207_v52, %v1199_v43 }
 0x98a   : > { %1292 = vrot.lane.b32.xlu0 %v1209_v53, %s2467_s18  ;;  %s1754_s18 = sshll.u32 %s2582_s28, 7  ;;  %s1537_s28 = scalar_lea.sflag [#allocation5], %s673_s17 }
 0x98b   : > { %v1530_v4 = vpop.permute.xlu1 %1529  ;;  %s2984_s1 = scalar_lea.hbm %s3111_s15, %s1754_s18 }
 0x9fc   : > { %v1293_v54 = vpop.permute.xlu0 %1292 }
 0x9fd   : > { %1863 = vmatmul.mubr.msk.f32.vlgmr.msra.gmra.mrb[6].mxu0 %vm1161_vm4, %v1293_v54 }
 0x9fe   : > { %1874 = vmatprep.mubr.msk.f32.mxu0 %vm2462_vm1, %v2463_v5  ;;  %1915 = vmatpush3.bf16.msra.mxu0 %v1914_v58 }
 0xad0   : > { %v1362_v59 = vpop.f32.mrb[6].mxu0 }
 0xad1   : > { %v1363_v60 = vadd.f32 %v1362_v59, %v2947_v12  ;;  %v1864_v61 = vpop.f32.mrb[7].mxu0 }
 0xad3   : > { %v1445_v62 = vadd.f32 %v1441_v3, %v1363_v60 }
 0xad5   : > { %v1446_v5 = vmax.f32 %v1445_v62, 0.0 }
 0xad7   : > { %1875 = vmatmul.mubr.msk.f32.vlgmr.msra.gmra.mrb[8].mxu0 %vm1161_vm4, %v1446_v5 }
 0xbaa   : > { %v1525_v0 = vpop.f32.mrb[8].mxu0 }
 0xbab   : > { %v1526_v1 = vadd.f32 %v1751_v63, %v1525_v0  ;;  %v1876_v2 = vpop.f32.mrb[9].mxu0 }
 0xbad   : > { %v1533_v6 = vsel %vm1532_vm9, %v1526_v1, %v1530_v4 }
 0xbae   : > { %1535 = vst.msk [vmem:[%s675_s14] sm:$0xff] %vm1534_vm10, %v1533_v6 }
 0xbaf   : > { %2374 = shalt.err (!%p2371_p8)
}
 0xbb0   : > { %s2375_s17 = scalar_lea.hbm %s2984_s1, 128  ;;  %s2379_s20 = scalar_lea.hbm %s3111_s15, 1024 }
 0xbb1   : > { %p2376_p12 = scmp.ne.s32.totalorder %s2984_s1, %s2375_s17  ;;  %p2380_p6 = scmp.lt.u32.totalorder %s2984_s1, %s3111_s15 }
 0xbb2   : > { %p2381_p9 = scmp.lt.u32.totalorder %s2379_s20, %s2375_s17  ;;  %p2383_p1 = scmp.lt.u32.totalorder %s2375_s17, %s2984_s1 }
 0xbb3   : > { %p2377_p0 = pnand %p2376_p12, %p3112_p11 }
 0xbb4   : > { %p2382_p5 = por %p2381_p9, %p2380_p6 }
 0xbb5   : > { %p2378_p2 = pneg %p2377_p0 }
 0xbb6   : > { %p2384_p10 = por %p2383_p1, %p2382_p5 }
 0xbb8   : > { %p2385_p3 = pnand %p2384_p10, %p2378_p2 }
 0xbba   : > { %2388 = shalt.err (!%p2385_p3)
}
 0xbbb   : > { %1958 = dma.vmem_to_hbm [thread:$0]  (%p3112_p11), %s2986_s19, 128, %s2984_s1, %s1537_s28  }
 0xbbc PF: > { %s3113_s18 = sld [smem:[#allocation30_spill]]  ;;  %s3114_s0 = sld [smem:[#allocation28_spill]] }
 0xbbd   : > { %s3115_s29 = sld [smem:[#allocation34_spill]] }
 0xbc2   : > { %p2015_p4 = scmp.ge.s32.totalorder %s3113_s18, 2  ;;  %s1562_s2 = sand.u32 1, %s3114_s0  }
 0xbc3   : > { %p3116_p13 = scmp.ne.s32.totalorder %s3115_s29, 0  ;;  %s1563_s16 = scalar_lea.sflag [#allocation5], %s1562_s2 }
 0xbc5   : > { %p1992_p7 = pnand %p2015_p4, %p3116_p13 }
 0xbc7   : > { %2430 = dma.done.wait (!%p1992_p7), %s1563_s16, 128  }
 0xbc8   : > { %2432 = vsyncadd (!%p1992_p7), %s1563_s16, 4294967168  ;;  %s3117_s27 = sld [smem:[#allocation31_spill]]  ;;  %s3118_s26 = sld [smem:[#allocation29_spill]] }
 0xbc9   : > { %s3119_s17 = sld [smem:[#allocation32_spill]]  ;;  %s3120_s24 = smov %s2439_s25 }
 0xbce   : > { %p33_p8 = scmp.ge.s32.totalorder %s3117_s27, 10   ;;  %s3121_s25 = smov %s3118_s26 }
 0xbcf   : > { %s3122_s26 = smov %s3119_s17 }
 0xbd0   :  { %35 = sbr.rel (!%p33_p8) target bundleno = 18 (0x12), region = 168 }
 0xbd7   :  { %1568 = vsyncpa [#allocation4], 1 }
 0xbd8   :  { %1570 = vsyncpa [#allocation4 + $0x1], 1 }
 0xbd9   :  { %1571 = vsyncpa [#allocation7], 1 }
 0xbda   :  { %1572 = vsyncpa [#allocation10], 1 }
 0xbdb   :  { %1573 = vsyncpa [#allocation13], 1 }
 0xbdc   :  { %1574 = vsyncpa [#allocation16], 1 }
 0xbdd   :  { %1575 = vsyncpa [#allocation19], 1 }
 0xbde   :  { %1576 = vsyncpa [#allocation5], 1 }
 0xbdf   :  { %1578 = vsyncpa [#allocation5 + $0x1], 1 }

</bundles_post_ra>
